<compile_context>
chip_gen: v5e
topology: v5e:2x2
jax: 0.10.0
libtpu: 0.0.40
codegen_flags: <defaults>
</compile_context>

<pallas_src>
import functools

import jax
import jax.numpy as jnp
from jax import lax
from jax.experimental import pallas as pl
from jax.experimental.pallas import tpu as pltpu


def _of_penalty_kernel(w_ref, v_ref, out_ref, *, beta, tb):
    """One grid step: `tb` batch items, every contraction on the VPU (no MXU).

    w_ref  : (tb, M, C)  W^T feature matrices, channels last (lane-dense)
    v_ref  : (tb, 2, C)  f32 power-iteration seeds, rows [v1; v2]
    out_ref: (1, 1, 1)   f32 partial penalty for this block of items
    """
    eps = jnp.float32(1e-30)

    def one_item(b, acc):
        # Single explicit upcast so all math is f32 (v5e VALUs have no bf16);
        # reused by all six passes below.
        Wt = w_ref[b].astype(jnp.float32)            # (M, C)
        V = v_ref[b]                                 # (2, C) f32
        v1, v2 = V[0:1], V[1:2]                      # (1, C) rows

        # u = W^T v : contract over C (lane axis)        -> (M, 1)
        u1 = jnp.sum(Wt * v1, axis=1, keepdims=True)
        u2 = jnp.sum(Wt * v2, axis=1, keepdims=True)
        # x = W u  = AAT v : contract over M (sublanes)   -> (1, C)
        x1 = jnp.sum(Wt * u1, axis=0, keepdims=True)
        x2 = jnp.sum(Wt * u2, axis=0, keepdims=True)
        # s = W^T x : contract over C again               -> (M, 1)
        s1 = jnp.sum(Wt * x1, axis=1, keepdims=True)
        s2 = jnp.sum(Wt * x2, axis=1, keepdims=True)

        # Largest eigenvalue estimate of AAT (Rayleigh quotient at x1 = AAT v1):
        #   (AAT x1).x1 = ||W^T x1||^2 = ||s1||^2
        largest = jnp.sum(s1 * s1) / (jnp.sum(x1 * x1) + eps)

        # Shifted matrix A' = AAT - largest*I applied without materializing it:
        #   x'      = A' v2   = x2 - largest * v2
        #   W^T x'  = s2 - largest * u2
        #   (A'x').x' = ||W^T x'||^2 - largest * ||x'||^2
        xp = x2 - largest * v2                       # (1, C)
        xpw = s2 - largest * u2                      # (M, 1)
        den = jnp.sum(xp * xp)
        tmp = (jnp.sum(xpw * xpw) - largest * den) / (den + eps)

        # smallest = tmp + largest ; penalty = (largest - smallest)*beta = -tmp*beta
        return acc - tmp * beta

    total = lax.fori_loop(0, tb, one_item, jnp.float32(0.0))
    out_ref[...] = jnp.reshape(total, (1, 1, 1))


def _random_vectors(key, B, C):
    """Deterministic replacement for the two torch.randn(B, C, 1) draws."""
    k1, k2 = jax.random.split(key)
    v1 = jax.random.normal(k1, (B, 1, C), dtype=jnp.float32)
    v2 = jax.random.normal(k2, (B, 1, C), dtype=jnp.float32)
    return v1, v2


def _vmem_capacity():
    try:
        return int(pltpu.get_tpu_info().vmem_capacity_bytes)
    except Exception:
        return 64 << 20        # conservative fallback (v7x per-core VMEM)


def _pick_tb(B, item_dma_bytes, item_f32_bytes, vmem_cap):
    """Items per grid step + explicit VMEM limit.

    Keeps the double-buffered input slab plus in-kernel f32 temporaries inside
    a generation-aware budget (<= ~24 MiB slab so a v6e-tuned choice never
    OOMs v7x's 64 MiB VMEM), but makes each step as large as possible so the
    ~0.35 us per-grid-step overhead is amortized.
    """
    budget = min(vmem_cap // 2, 24 << 20)
    temps = 3 * item_f32_bytes + (1 << 20)      # f32 W copy + product temp + headroom
    avail = max(budget - temps, 2 * item_dma_bytes)
    tb = int(max(1, min(B, avail // (2 * item_dma_bytes))))
    if B >= 2:
        # Keep at least 2 parallel grid steps so v7x can split across its 2 TCs.
        tb = min(tb, B // 2)
    tb = max(tb, 1)
    while B % tb:
        tb -= 1
    slab = 2 * tb * item_dma_bytes              # double-buffered inputs
    vmem_limit = slab + temps + (8 << 20)
    vmem_limit = max(vmem_limit, 16 << 20)
    vmem_limit = min(vmem_limit, vmem_cap - (4 << 20))
    return tb, int(vmem_limit)


def _apply_penalty(x, key, beta, storage_dtype=None):
    B, C, H, Wd = x.shape
    M = H * Wd
    store_dt = x.dtype if storage_dtype is None else storage_dtype

    # Lane-dense, channels-last layout (B, M, C); optional bf16 storage halves
    # HBM traffic (review item: the kernel is HBM/VALU bound after the MXU fix).
    # TODO(synk): add a (C, M)-layout variant (column seeds) for inputs whose M
    # is 128-aligned but C is tiny/unaligned; channels-last pads lanes there.
    Wt = jnp.transpose(x.reshape(B, C, M), (0, 2, 1)).astype(store_dt)

    v1, v2 = _random_vectors(key, B, C)
    V = jnp.concatenate([v1, v2], axis=1)       # (B, 2, C), kept in f32

    itemsize = jnp.dtype(store_dt).itemsize
    item_dma = M * C * itemsize + 2 * C * 4
    item_f32 = M * C * 4
    tb, vmem_limit = _pick_tb(B, item_dma, item_f32, _vmem_capacity())
    G = B // tb

    flops = int(12 * M * C * B)                 # 6 multiply+reduce passes per item
    bytes_accessed = int(B * M * C * itemsize + B * 2 * C * 4 + G * 4)

    # NOTE: if per-step DMA ever becomes exposed (very small items on v7x),
    # add pipeline_mode=pl.Buffered(3) to the W in_spec and scale the budget.
    out = pl.pallas_call(
        functools.partial(_of_penalty_kernel, beta=float(beta), tb=tb),
        out_shape=jax.ShapeDtypeStruct((G, 1, 1), jnp.float32),
        grid=(G,),
        in_specs=[
            pl.BlockSpec((tb, M, C), lambda g: (g, 0, 0)),   # W^T slab per step
            pl.BlockSpec((tb, 2, C), lambda g: (g, 0, 0)),   # f32 seeds per step
        ],
        out_specs=pl.BlockSpec((1, 1, 1), lambda g: (g, 0, 0)),
        compiler_params=pltpu.CompilerParams(
            dimension_semantics=("parallel",),
            vmem_limit_bytes=vmem_limit),
        cost_estimate=pl.CostEstimate(
            flops=flops, transcendentals=0, bytes_accessed=bytes_accessed),
    )(Wt, V)

    # Matches `singular_penalty.sum() / (x.size(0) / batches)` (denominator == 1.0).
    return jnp.sum(out) / (x.shape[0] / B)


def of_penalty_forward(inputs, key, beta=1e-6, storage_dtype=None):
    """OFPenalty.forward. storage_dtype=jnp.bfloat16 is recommended for
    production (halves HBM bytes; math stays f32 in-kernel)."""
    if not isinstance(inputs, (tuple, list)):
        inputs = (inputs,)
    total = jnp.zeros((), jnp.float32)
    for i, x in enumerate(inputs):
        total = total + _apply_penalty(
            x, jax.random.fold_in(key, i), beta, storage_dtype=storage_dtype)
    return total


def _reference_forward(inputs, key, beta=1e-6, quantize_dtype=None):
    """Pure-JAX reference mirroring the PyTorch code (materializes AAT and I).

    quantize_dtype applies the same weight-storage quantization the kernel
    uses (e.g. bf16) before doing all math in f32.
    """
    if not isinstance(inputs, (tuple, list)):
        inputs = (inputs,)
    total = jnp.zeros((), jnp.float32)
    for i, x in enumerate(inputs):
        B, C, H, Wd = x.shape
        Wmat = x.reshape(B, C, H * Wd)
        if quantize_dtype is not None:
            Wmat = Wmat.astype(quantize_dtype)
        Wmat = Wmat.astype(jnp.float32)
        v1, v2 = _random_vectors(jax.random.fold_in(key, i), B, C)

        AAT = jnp.einsum("bnm,bkm->bnk", Wmat, Wmat)

        def dom(A, v):                 # v: (B, 1, N) row vectors, A symmetric
            xr = jnp.einsum("bin,bnk->bik", v, A)       # one power step
            Ax = jnp.einsum("bin,bnk->bik", xr, A)
            num = jnp.sum(Ax * xr, axis=(1, 2))
            den = jnp.sum(xr * xr, axis=(1, 2))
            return num / den

        largest = dom(AAT, v1)
        eye = jnp.eye(C, dtype=jnp.float32)[None]
        tmp = dom(AAT - largest[:, None, None] * eye, v2)
        smallest = tmp + largest
        total = total + jnp.sum((largest - smallest) * beta) / (x.shape[0] / B)
    return total


if __name__ == "__main__":
    key = jax.random.PRNGKey(0)
    xk1, xk2, rk = jax.random.split(key, 3)

    # Tiny NCHW input matching the module's feature-map contract.
    x_small = jax.random.normal(xk1, (2, 4, 16, 16), dtype=jnp.float32)
    # Small but representative shape (128-aligned channel dim -> dense lanes).
    x_repr = jax.random.normal(xk2, (2, 128, 8, 8), dtype=jnp.float32)

    # f32 storage path vs f32 reference.
    for x in (x_small, x_repr):
        out = jax.block_until_ready(of_penalty_forward(x, rk, beta=1e-6))
        ref = jax.block_until_ready(_reference_forward(x, rk, beta=1e-6))
        assert jnp.allclose(out, ref, rtol=2e-3, atol=1e-10), (x.shape, out, ref)

    # bf16 weight-storage path vs reference with identical bf16 quantization.
    out_bf16 = jax.block_until_ready(
        of_penalty_forward(x_repr, rk, beta=1e-6, storage_dtype=jnp.bfloat16))
    ref_bf16 = jax.block_until_ready(
        _reference_forward(x_repr, rk, beta=1e-6, quantize_dtype=jnp.bfloat16))
    assert jnp.isfinite(out_bf16)
    assert jnp.allclose(out_bf16, ref_bf16, rtol=1e-2, atol=1e-10), (out_bf16, ref_bf16)

    print("KERNEL_OK")
</pallas_src>

<mosaic_0001>
module attributes {stable_mosaic.version = 11 : i64} {
  func.func @_of_penalty_kernel(%arg0: i32, %arg1: memref<1x256x4xf32, #tpu.memory_space<vmem>>, %arg2: memref<1x2x4xf32, #tpu.memory_space<vmem>>, %arg3: memref<1x1x1xf32, #tpu.memory_space<vmem>>) attributes {dimension_semantics = [#tpu.dimension_semantics<parallel>], iteration_bounds = array<i64: 2>, scalar_prefetch = 0 : i64, scratch_operands = 0 : i64, tpu.core_type = #tpu.core_type<tc>, window_params = [{transform_indices = @transform_0, window_bounds = array<i64: 1, 256, 4>}, {transform_indices = @transform_1, window_bounds = array<i64: 1, 2, 4>}, {transform_indices = @transform_2, window_bounds = array<i64: 1, 1, 1>}]} {
    %cst = arith.constant 1.000000e-30 : f32
    %cst_0 = arith.constant 0.000000e+00 : f32
    %c0_i32 = arith.constant 0 : i32
    %0 = arith.index_cast %c0_i32 : i32 to index
    %c0 = arith.constant 0 : index
    %c0_1 = arith.constant 0 : index
    %1 = vector.load %arg1[%0, %c0, %c0_1] : memref<1x256x4xf32, #tpu.memory_space<vmem>>, vector<1x256x4xf32>
    %2 = vector.shape_cast %1 : vector<1x256x4xf32> to vector<256x4xf32>
    %3 = arith.index_cast %c0_i32 : i32 to index
    %c0_2 = arith.constant 0 : index
    %c0_3 = arith.constant 0 : index
    %4 = vector.load %arg2[%3, %c0_2, %c0_3] : memref<1x2x4xf32, #tpu.memory_space<vmem>>, vector<1x2x4xf32>
    %5 = vector.shape_cast %4 : vector<1x2x4xf32> to vector<2x4xf32>
    %6 = vector.extract_strided_slice %5 {offsets = [0, 0], sizes = [1, 4], strides = [1, 1]} : vector<2x4xf32> to vector<1x4xf32>
    %7 = vector.extract_strided_slice %5 {offsets = [1, 0], sizes = [1, 4], strides = [1, 1]} : vector<2x4xf32> to vector<1x4xf32>
    %8 = vector.broadcast %6 : vector<1x4xf32> to vector<256x4xf32>
    %9 = arith.mulf %2, %8 : vector<256x4xf32>
    %cst_4 = arith.constant dense<0.000000e+00> : vector<256xf32>
    %10 = vector.multi_reduction <add>, %9, %cst_4 [1] : vector<256x4xf32> to vector<256xf32>
    %11 = vector.shape_cast %10 : vector<256xf32> to vector<256x1xf32>
    %12 = vector.broadcast %7 : vector<1x4xf32> to vector<256x4xf32>
    %13 = arith.mulf %2, %12 : vector<256x4xf32>
    %cst_5 = arith.constant dense<0.000000e+00> : vector<256xf32>
    %14 = vector.multi_reduction <add>, %13, %cst_5 [1] : vector<256x4xf32> to vector<256xf32>
    %15 = vector.shape_cast %14 : vector<256xf32> to vector<256x1xf32>
    %16 = vector.broadcast %11 : vector<256x1xf32> to vector<256x4xf32>
    %17 = arith.mulf %2, %16 : vector<256x4xf32>
    %cst_6 = arith.constant dense<0.000000e+00> : vector<4xf32>
    %18 = vector.multi_reduction <add>, %17, %cst_6 [0] : vector<256x4xf32> to vector<4xf32>
    %19 = vector.shape_cast %18 : vector<4xf32> to vector<1x4xf32>
    %20 = vector.broadcast %15 : vector<256x1xf32> to vector<256x4xf32>
    %21 = arith.mulf %2, %20 : vector<256x4xf32>
    %cst_7 = arith.constant dense<0.000000e+00> : vector<4xf32>
    %22 = vector.multi_reduction <add>, %21, %cst_7 [0] : vector<256x4xf32> to vector<4xf32>
    %23 = vector.shape_cast %22 : vector<4xf32> to vector<1x4xf32>
    %24 = vector.broadcast %19 : vector<1x4xf32> to vector<256x4xf32>
    %25 = arith.mulf %2, %24 : vector<256x4xf32>
    %cst_8 = arith.constant dense<0.000000e+00> : vector<256xf32>
    %26 = vector.multi_reduction <add>, %25, %cst_8 [1] : vector<256x4xf32> to vector<256xf32>
    %27 = vector.shape_cast %26 : vector<256xf32> to vector<256x1xf32>
    %28 = vector.broadcast %23 : vector<1x4xf32> to vector<256x4xf32>
    %29 = arith.mulf %2, %28 : vector<256x4xf32>
    %cst_9 = arith.constant dense<0.000000e+00> : vector<256xf32>
    %30 = vector.multi_reduction <add>, %29, %cst_9 [1] : vector<256x4xf32> to vector<256xf32>
    %31 = vector.shape_cast %30 : vector<256xf32> to vector<256x1xf32>
    %32 = arith.mulf %27, %27 : vector<256x1xf32>
    %33 = vector.shape_cast %32 : vector<256x1xf32> to vector<1x256x1xf32>
    %cst_10 = arith.constant dense<0.000000e+00> : vector<1xf32>
    %34 = vector.multi_reduction <add>, %33, %cst_10 [1, 2] : vector<1x256x1xf32> to vector<1xf32>
    %35 = vector.shape_cast %34 : vector<1xf32> to vector<1x1x1xf32>
    %36 = vector.extract %35[0, 0, 0] : f32 from vector<1x1x1xf32>
    %37 = arith.mulf %19, %19 : vector<1x4xf32>
    %38 = vector.shape_cast %37 : vector<1x4xf32> to vector<1x1x4xf32>
    %cst_11 = arith.constant dense<0.000000e+00> : vector<1xf32>
    %39 = vector.multi_reduction <add>, %38, %cst_11 [1, 2] : vector<1x1x4xf32> to vector<1xf32>
    %40 = vector.shape_cast %39 : vector<1xf32> to vector<1x1x1xf32>
    %41 = vector.extract %40[0, 0, 0] : f32 from vector<1x1x1xf32>
    %42 = arith.addf %41, %cst : f32
    %43 = arith.divf %36, %42 : f32
    %44 = vector.broadcast %43 : f32 to vector<1x4xf32>
    %45 = arith.mulf %44, %7 : vector<1x4xf32>
    %46 = arith.subf %23, %45 : vector<1x4xf32>
    %47 = vector.broadcast %43 : f32 to vector<256x1xf32>
    %48 = arith.mulf %47, %15 : vector<256x1xf32>
    %49 = arith.subf %31, %48 : vector<256x1xf32>
    %50 = arith.mulf %46, %46 : vector<1x4xf32>
    %51 = vector.shape_cast %50 : vector<1x4xf32> to vector<1x1x4xf32>
    %cst_12 = arith.constant dense<0.000000e+00> : vector<1xf32>
    %52 = vector.multi_reduction <add>, %51, %cst_12 [1, 2] : vector<1x1x4xf32> to vector<1xf32>
    %53 = vector.shape_cast %52 : vector<1xf32> to vector<1x1x1xf32>
    %54 = vector.extract %53[0, 0, 0] : f32 from vector<1x1x1xf32>
    %55 = arith.mulf %49, %49 : vector<256x1xf32>
    %56 = vector.shape_cast %55 : vector<256x1xf32> to vector<1x256x1xf32>
    %cst_13 = arith.constant dense<0.000000e+00> : vector<1xf32>
    %57 = vector.multi_reduction <add>, %56, %cst_13 [1, 2] : vector<1x256x1xf32> to vector<1xf32>
    %58 = vector.shape_cast %57 : vector<1xf32> to vector<1x1x1xf32>
    %59 = vector.extract %58[0, 0, 0] : f32 from vector<1x1x1xf32>
    %60 = arith.mulf %43, %54 : f32
    %61 = arith.subf %59, %60 : f32
    %62 = arith.addf %54, %cst : f32
    %63 = arith.divf %61, %62 : f32
    %cst_14 = arith.constant 9.99999997E-7 : f32
    %64 = arith.mulf %63, %cst_14 : f32
    %65 = arith.subf %cst_0, %64 : f32
    %c1_i32 = arith.constant 1 : i32
    %66 = vector.broadcast %65 : f32 to vector<1x1x1xf32>
    %c0_15 = arith.constant 0 : index
    %c0_16 = arith.constant 0 : index
    %c0_17 = arith.constant 0 : index
    %67 = vector.load %arg3[%c0_15, %c0_16, %c0_17] : memref<1x1x1xf32, #tpu.memory_space<vmem>>, vector<1x1x1xf32>
    tpu.vector_store %arg3[%c0_15, %c0_16, %c0_17], %66 {strides = array<i32>} : memref<1x1x1xf32, #tpu.memory_space<vmem>>, vector<1x1x1xf32>,
    return
  }
  func.func @transform_0(%arg0: i32) -> (i32, i32, i32) {
    %c0_i32 = arith.constant 0 : i32
    %c0_i32_0 = arith.constant 0 : i32
    %c0_i32_1 = arith.constant 0 : i32
    return %arg0, %c0_i32, %c0_i32_0 : i32, i32, i32
  }
  func.func @transform_1(%arg0: i32) -> (i32, i32, i32) {
    %c0_i32 = arith.constant 0 : i32
    %c0_i32_0 = arith.constant 0 : i32
    %c0_i32_1 = arith.constant 0 : i32
    return %arg0, %c0_i32, %c0_i32_0 : i32, i32, i32
  }
  func.func @transform_2(%arg0: i32) -> (i32, i32, i32) {
    %c0_i32 = arith.constant 0 : i32
    %c0_i32_0 = arith.constant 0 : i32
    %c0_i32_1 = arith.constant 0 : i32
    return %arg0, %c0_i32, %c0_i32_0 : i32, i32, i32
  }
}

</mosaic_0001>

<bundles_post_ra>
// kernel: tpu_custom_call.1
= control target key start
LH: loop header
LB: loop body
LE: loop exit
PB: predicated region body
PF: predicated region fallthrough
CT: control target
= control target key end

     0   :  { %s1402_s9 = smov 0   ;;  %s2395_s0 = inlined_call_operand.vmem [shape: f32[2,256,4], index: 0, kind: input, shape index: {}]   ;;  %s2396_s1 = inlined_call_operand.vmem [shape: f32[2,2,4], index: 1, kind: input, shape index: {}]   ;;  %s2397_s2 = inlined_call_operand.vmem [shape: f32[2,1,1], index: 2, kind: output, shape index: {}]  }
   0x1 LB: > { %s1311_s10 = sadd.s32 4294967295, %s1385_s9   ;;  %p1315_p0 = scmp.ge.s32.totalorder %s1385_s9, 1  ;;  %s1385_s9 = sphi %s1402_s9, %s12_s9  }
   0x2   : > { %p121_p1 = scmp.lt.s32.totalorder %s1385_s9, 3 }
   0x4   : > { %p122_p2 = pnand %p1315_p0, %p121_p1 }
   0x6   : > { %125 = sbr.rel (%p122_p2) target bundleno = 1065 (0x429), region = 28 }
   0xb   : > { %p145_p3 = scmp.lt.s32.totalorder %s1311_s10, 1  ;;  %vm223_vm0 = vcmask 31744   ;;  %vm1013_vm1 = vcmask 24576   ;;  %vm939_vm2 = vcmask 7168   ;;  %vm1250_vm11 = vcmask 0  }
   0xd   : > { %s2450_s10 = smov (!%p145_p3, %s1311_s10), 1 }
   0xe   : > { %s1321_s11 = sshll.u32 %s2450_s10, 8  ;;  %s1318_s12 = sshll.u32 %s2450_s10, 1 }
   0xf   : > { %s1417_s15 = scalar_lea.vmem %s2395_s0, %s1321_s11  ;;  %s1422_s18 = scalar_lea.vmem %s2396_s1, %s1318_s12 }
  0x10   : > { %v1425_v0 = vld [vmem:[%s1417_s15] sm:$0xff]  ;;  %v1431_v2 = vld [vmem:[%s1417_s15 + $0x10] sm:$0xff]  ;;  %v1446_v8 = vld [vmem:[%s1417_s15 + $0x8] sm:$0xff]  ;;  %s156_s6 = scalar_lea.vmem %s2397_s2, %s2450_s10 }
  0x11   : > { %v1428_v1 = vld [vmem:[%s1422_s18] sm:$0x3]  ;;  %v1449_v9 = vld [vmem:[%s1417_s15 + $0x18] sm:$0xff]  ;;  %v1455_v13 = vld [vmem:[%s1417_s15 + $0x28] sm:$0xff] }
  0x12   : > { %v1434_v3 = vperm.slane %v1428_v1, 0  ;;  %v1437_v4 = vld [vmem:[%s1417_s15 + $0x20] sm:$0xff]  ;;  %v1467_v20 = vld [vmem:[%s1417_s15 + $0x30] sm:$0xff]  ;;  %v1470_v21 = vld [vmem:[%s1417_s15 + $0x38] sm:$0xff] }
  0x13   : > { %v1473_v22 = vld [vmem:[%s1417_s15 + $0x40] sm:$0xff]  ;;  %v1485_v29 = vld [vmem:[%s1417_s15 + $0x48] sm:$0xff]  ;;  %v1488_v30 = vld [vmem:[%s1417_s15 + $0x50] sm:$0xff] }
  0x14   : > { %v191_v5 = vmul.f32 %v1434_v3, %v1425_v0  ;;  %v193_v6 = vmul.f32 %v1434_v3, %v1431_v2  ;;  %v195_v7 = vmul.f32 %v1434_v3, %v1437_v4  ;;  %v192_v14 = vmul.f32 %v1434_v3, %v1446_v8  ;;  %v1491_v31 = vld [vmem:[%s1417_s15 + $0x58] sm:$0xff]  ;;  %v1503_v38 = vld [vmem:[%s1417_s15 + $0x60] sm:$0xff]  ;;  %v1506_v39 = vld [vmem:[%s1417_s15 + $0x68] sm:$0xff] }
  0x15   : > { %v194_v15 = vmul.f32 %v1434_v3, %v1449_v9  ;;  %v196_v16 = vmul.f32 %v1434_v3, %v1455_v13  ;;  %v197_v23 = vmul.f32 %v1434_v3, %v1467_v20  ;;  %v198_v24 = vmul.f32 %v1434_v3, %v1470_v21  ;;  %v1509_v40 = vld [vmem:[%s1417_s15 + $0x70] sm:$0xff]  ;;  %v1521_v47 = vld [vmem:[%s1417_s15 + $0x78] sm:$0xff]  ;;  %v1524_v48 = vld [vmem:[%s1417_s15 + $0x80] sm:$0xff] }
  0x16   : > { %v224_v10 = vsel %vm223_vm0, %v191_v5, 0.0  ;;  %v230_v11 = vsel %vm223_vm0, %v193_v6, 0.0  ;;  %v236_v12 = vsel %vm223_vm0, %v195_v7, 0.0  ;;  %v227_v17 = vsel %vm223_vm0, %v192_v14, 0.0  ;;  %v1527_v49 = vld [vmem:[%s1417_s15 + $0x88] sm:$0xff]  ;;  %v1539_v56 = vld [vmem:[%s1417_s15 + $0x90] sm:$0xff] }
  0x17   : > { %225 = vadd.xlane.f32.xlu0 %v224_v10  ;;  %231 = vadd.xlane.f32.xlu1 %v230_v11  ;;  %v233_v18 = vsel %vm223_vm0, %v194_v15, 0.0  ;;  %v239_v19 = vsel %vm223_vm0, %v196_v16, 0.0  ;;  %v199_v25 = vmul.f32 %v1434_v3, %v1473_v22  ;;  %v242_v26 = vsel %vm223_vm0, %v197_v23, 0.0  ;;  %v1542_v57 = vld [vmem:[%s1417_s15 + $0x98] sm:$0xff]  ;;  %v1545_v58 = vld [vmem:[%s1417_s15 + $0xa0] sm:$0xff]  ;;  %v1557_v6 = vld [vmem:[%s1417_s15 + $0xa8] sm:$0xff] }
  0x18   : > { %237 = vadd.xlane.f32.xlu2 %v236_v12  ;;  %v245_v27 = vsel %vm223_vm0, %v198_v24, 0.0  ;;  %v200_v32 = vmul.f32 %v1434_v3, %v1485_v29  ;;  %v201_v33 = vmul.f32 %v1434_v3, %v1488_v30  ;;  %v202_v34 = vmul.f32 %v1434_v3, %v1491_v31  ;;  %v1560_v7 = vld [vmem:[%s1417_s15 + $0xb0] sm:$0xff]  ;;  %v1563_v10 = vld [vmem:[%s1417_s15 + $0xb8] sm:$0xff] }
  0x19   : > { %v248_v28 = vsel %vm223_vm0, %v199_v25, 0.0  ;;  %v203_v41 = vmul.f32 %v1434_v3, %v1503_v38  ;;  %v204_v42 = vmul.f32 %v1434_v3, %v1506_v39  ;;  %v205_v43 = vmul.f32 %v1434_v3, %v1509_v40  ;;  %v1581_v23 = vld [vmem:[%s1417_s15 + $0xd0] sm:$0xff] }
  0x1a   : > { %v251_v35 = vsel %vm223_vm0, %v200_v32, 0.0  ;;  %v254_v36 = vsel %vm223_vm0, %v201_v33, 0.0  ;;  %v257_v37 = vsel %vm223_vm0, %v202_v34, 0.0  ;;  %v206_v50 = vmul.f32 %v1434_v3, %v1521_v47  ;;  %v1593_v33 = vld [vmem:[%s1417_s15 + $0xd8] sm:$0xff]  ;;  %v1596_v34 = vld [vmem:[%s1417_s15 + $0xe0] sm:$0xff] }
  0x1b   : > { %v260_v44 = vsel %vm223_vm0, %v203_v41, 0.0  ;;  %v263_v45 = vsel %vm223_vm0, %v204_v42, 0.0  ;;  %v266_v46 = vsel %vm223_vm0, %v205_v43, 0.0  ;;  %v207_v51 = vmul.f32 %v1434_v3, %v1524_v48 }
  0x1c   : > { %v208_v52 = vmul.f32 %v1434_v3, %v1527_v49  ;;  %v269_v53 = vsel %vm223_vm0, %v206_v50, 0.0  ;;  %v209_v59 = vmul.f32 %v1434_v3, %v1539_v56  ;;  %v210_v60 = vmul.f32 %v1434_v3, %v1542_v57 }
  0x1d   : > { %v272_v54 = vsel %vm223_vm0, %v207_v51, 0.0  ;;  %v211_v61 = vmul.f32 %v1434_v3, %v1545_v58  ;;  %v212_v11 = vmul.f32 %v1434_v3, %v1557_v6  ;;  %v213_v12 = vmul.f32 %v1434_v3, %v1560_v7 }
  0x1e   : > { %v275_v55 = vsel %vm223_vm0, %v208_v52, 0.0  ;;  %v278_v62 = vsel %vm223_vm0, %v209_v59, 0.0  ;;  %v281_v63 = vsel %vm223_vm0, %v210_v60, 0.0  ;;  %v214_v14 = vmul.f32 %v1434_v3, %v1563_v10 }
  0x1f   : > { %228 = vadd.xlane.f32.xlu0 %v227_v17  ;;  %234 = vadd.xlane.f32.xlu1 %v233_v18  ;;  %v284_v5 = vsel %vm223_vm0, %v211_v61, 0.0  ;;  %v287_v15 = vsel %vm223_vm0, %v212_v11, 0.0  ;;  %v290_v16 = vsel %vm223_vm0, %v213_v12, 0.0  ;;  %v1575_v18 = vld [vmem:[%s1417_s15 + $0xc0] sm:$0xff] }
  0x20   : > { %240 = vadd.xlane.f32.xlu2 %v239_v19  ;;  %v293_v17 = vsel %vm223_vm0, %v214_v14, 0.0  ;;  %v1578_v19 = vld [vmem:[%s1417_s15 + $0xc8] sm:$0xff]  ;;  %v215_v24 = vmul.f32 %v1434_v3, %v1575_v18 }
  0x21   : > { %v216_v25 = vmul.f32 %v1434_v3, %v1578_v19 }
  0x27   : > { %243 = vadd.xlane.f32.xlu0 %v242_v26  ;;  %246 = vadd.xlane.f32.xlu1 %v245_v27  ;;  %v217_v26 = vmul.f32 %v1434_v3, %v1581_v23  ;;  %v296_v27 = vsel %vm223_vm0, %v215_v24, 0.0 }
  0x28   : > { %249 = vadd.xlane.f32.xlu2 %v248_v28  ;;  %v299_v28 = vsel %vm223_vm0, %v216_v25, 0.0 }
  0x29   : > { %v302_v32 = vsel %vm223_vm0, %v217_v26, 0.0 }
  0x2f   : > { %252 = vadd.xlane.f32.xlu0 %v251_v35  ;;  %255 = vadd.xlane.f32.xlu1 %v254_v36  ;;  %v1599_v35 = vld [vmem:[%s1417_s15 + $0xe8] sm:$0xff]  ;;  %v218_v36 = vmul.f32 %v1434_v3, %v1593_v33 }
  0x30   : > { %258 = vadd.xlane.f32.xlu2 %v257_v37  ;;  %v219_v37 = vmul.f32 %v1434_v3, %v1596_v34  ;;  %v220_v41 = vmul.f32 %v1434_v3, %v1599_v35 }
  0x31   : > { %v305_v42 = vsel %vm223_vm0, %v218_v36, 0.0 }
  0x32   : > { %v308_v43 = vsel %vm223_vm0, %v219_v37, 0.0 }
  0x37   : > { %261 = vadd.xlane.f32.xlu0 %v260_v44  ;;  %264 = vadd.xlane.f32.xlu1 %v263_v45  ;;  %v311_v44 = vsel %vm223_vm0, %v220_v41, 0.0  ;;  %v1611_v45 = vld [vmem:[%s1417_s15 + $0xf0] sm:$0xff] }
  0x38   : > { %267 = vadd.xlane.f32.xlu2 %v266_v46  ;;  %v1614_v46 = vld [vmem:[%s1417_s15 + $0xf8] sm:$0xff]  ;;  %v221_v50 = vmul.f32 %v1434_v3, %v1611_v45 }
  0x39   : > { %v222_v51 = vmul.f32 %v1434_v3, %v1614_v46 }
  0x3a   : > { %v314_v52 = vsel %vm223_vm0, %v221_v50, 0.0 }
  0x3f   : > { %270 = vadd.xlane.f32.xlu0 %v269_v53  ;;  %273 = vadd.xlane.f32.xlu1 %v272_v54  ;;  %v317_v53 = vsel %vm223_vm0, %v222_v51, 0.0 }
  0x40   : > { %276 = vadd.xlane.f32.xlu2 %v275_v55 }
  0x47   : > { %279 = vadd.xlane.f32.xlu0 %v278_v62  ;;  %282 = vadd.xlane.f32.xlu1 %v281_v63 }
  0x48   : > { %285 = vadd.xlane.f32.xlu2 %v284_v5 }
  0x4f   : > { %288 = vadd.xlane.f32.xlu0 %v287_v15  ;;  %291 = vadd.xlane.f32.xlu1 %v290_v16 }
  0x50   : > { %294 = vadd.xlane.f32.xlu2 %v293_v17 }
  0x57   : > { %297 = vadd.xlane.f32.xlu0 %v296_v27  ;;  %300 = vadd.xlane.f32.xlu1 %v299_v28 }
  0x58   : > { %303 = vadd.xlane.f32.xlu2 %v302_v32 }
  0x5f   : > { %306 = vadd.xlane.f32.xlu0 %v305_v42  ;;  %309 = vadd.xlane.f32.xlu1 %v308_v43 }
  0x60   : > { %312 = vadd.xlane.f32.xlu2 %v311_v44 }
  0x67   : > { %315 = vadd.xlane.f32.xlu0 %v314_v52  ;;  %318 = vadd.xlane.f32.xlu1 %v317_v53 }
  0x8a   : > { %v226_v54 = vpop.xlane.xlu0 %225  ;;  %v232_v55 = vpop.xlane.xlu1 %231 }
  0x8b   : > { %v238_v59 = vpop.xlane.xlu2 %237  ;;  %v449_v60 = vmul.f32 %v226_v54, %v1425_v0  ;;  %v451_v63 = vmul.f32 %v232_v55, %v1431_v2 }
  0x8c   : > { %v453_v17 = vmul.f32 %v238_v59, %v1437_v4 }
  0x8d   : > { %v481_v3 = vsel %vm223_vm0, %v449_v60, 0.0  ;;  %v484_v16 = vsel %vm223_vm0, %v451_v63, 0.0 }
  0x8e   : > { %v488_v36 = vsel %vm223_vm0, %v453_v17, 0.0 }
  0x92   : > { %v229_v61 = vpop.xlane.xlu0 %228  ;;  %v235_v62 = vpop.xlane.xlu1 %234 }
  0x93   : > { %v450_v5 = vmul.f32 %v229_v61, %v1446_v8  ;;  %v241_v11 = vpop.xlane.xlu2 %240  ;;  %v452_v14 = vmul.f32 %v235_v62, %v1449_v9 }
  0x94   : > { %v454_v26 = vmul.f32 %v241_v11, %v1455_v13 }
  0x95   : > { %v482_v12 = vsel %vm223_vm0, %v450_v5, 0.0  ;;  %v486_v25 = vsel %vm223_vm0, %v452_v14, 0.0 }
  0x96   : > { %v483_v15 = vadd.f32 %v482_v12, %v481_v3  ;;  %v490_v43 = vsel %vm223_vm0, %v454_v26, 0.0 }
  0x98   : > { %v485_v24 = vadd.f32 %v484_v16, %v483_v15 }
  0x9a   : > { %v487_v27 = vadd.f32 %v486_v25, %v485_v24  ;;  %v244_v28 = vpop.xlane.xlu0 %243  ;;  %v247_v32 = vpop.xlane.xlu1 %246 }
  0x9b   : > { %v455_v37 = vmul.f32 %v244_v28, %v1467_v20  ;;  %v250_v41 = vpop.xlane.xlu2 %249  ;;  %v456_v44 = vmul.f32 %v247_v32, %v1470_v21 }
  0x9c   : > { %v489_v42 = vadd.f32 %v488_v36, %v487_v27  ;;  %v457_v50 = vmul.f32 %v250_v41, %v1473_v22 }
  0x9d   : > { %v492_v52 = vsel %vm223_vm0, %v455_v37, 0.0  ;;  %v494_v54 = vsel %vm223_vm0, %v456_v44, 0.0 }
  0x9e   : > { %v491_v51 = vadd.f32 %v490_v43, %v489_v42  ;;  %v496_v55 = vsel %vm223_vm0, %v457_v50, 0.0 }
  0xa0   : > { %v493_v53 = vadd.f32 %v492_v52, %v491_v51 }
  0xa2   : > { %v495_v59 = vadd.f32 %v494_v54, %v493_v53  ;;  %v253_v60 = vpop.xlane.xlu0 %252  ;;  %v256_v61 = vpop.xlane.xlu1 %255 }
  0xa3   : > { %v458_v62 = vmul.f32 %v253_v60, %v1485_v29  ;;  %v459_v63 = vmul.f32 %v256_v61, %v1488_v30  ;;  %v259_v5 = vpop.xlane.xlu2 %258 }
  0xa4   : > { %v497_v11 = vadd.f32 %v496_v55, %v495_v59  ;;  %v460_v14 = vmul.f32 %v259_v5, %v1491_v31 }
  0xa5   : > { %v498_v3 = vsel %vm223_vm0, %v458_v62, 0.0  ;;  %v500_v12 = vsel %vm223_vm0, %v459_v63, 0.0 }
  0xa6   : > { %v499_v15 = vadd.f32 %v498_v3, %v497_v11  ;;  %v502_v17 = vsel %vm223_vm0, %v460_v14, 0.0 }
  0xa8   : > { %v501_v16 = vadd.f32 %v500_v12, %v499_v15 }
  0xaa   : > { %v262_v24 = vpop.xlane.xlu0 %261  ;;  %v265_v25 = vpop.xlane.xlu1 %264  ;;  %v503_v32 = vadd.f32 %v502_v17, %v501_v16 }
  0xab   : > { %v461_v26 = vmul.f32 %v262_v24, %v1503_v38  ;;  %v462_v27 = vmul.f32 %v265_v25, %v1506_v39  ;;  %v268_v28 = vpop.xlane.xlu2 %267 }
  0xac   : > { %v463_v41 = vmul.f32 %v268_v28, %v1509_v40 }
  0xad   : > { %v504_v36 = vsel %vm223_vm0, %v461_v26, 0.0  ;;  %v506_v37 = vsel %vm223_vm0, %v462_v27, 0.0 }
  0xae   : > { %v505_v42 = vadd.f32 %v504_v36, %v503_v32  ;;  %v508_v44 = vsel %vm223_vm0, %v463_v41, 0.0 }
  0xb0   : > { %v507_v43 = vadd.f32 %v506_v37, %v505_v42 }
  0xb2   : > { %v271_v50 = vpop.xlane.xlu0 %270  ;;  %v274_v51 = vpop.xlane.xlu1 %273  ;;  %v509_v55 = vadd.f32 %v508_v44, %v507_v43 }
  0xb3   : > { %v464_v52 = vmul.f32 %v271_v50, %v1521_v47  ;;  %v465_v53 = vmul.f32 %v274_v51, %v1524_v48  ;;  %v277_v54 = vpop.xlane.xlu2 %276 }
  0xb4   : > { %v466_v61 = vmul.f32 %v277_v54, %v1527_v49 }
  0xb5   : > { %v510_v59 = vsel %vm223_vm0, %v464_v52, 0.0  ;;  %v512_v60 = vsel %vm223_vm0, %v465_v53, 0.0 }
  0xb6   : > { %v511_v62 = vadd.f32 %v510_v59, %v509_v55  ;;  %v514_v5 = vsel %vm223_vm0, %v466_v61, 0.0 }
  0xb8   : > { %v513_v63 = vadd.f32 %v512_v60, %v511_v62 }
  0xba   : > { %v280_v11 = vpop.xlane.xlu0 %279  ;;  %v283_v3 = vpop.xlane.xlu1 %282  ;;  %v515_v16 = vadd.f32 %v514_v5, %v513_v63 }
  0xbb   : > { %v467_v12 = vmul.f32 %v280_v11, %v1539_v56  ;;  %v468_v14 = vmul.f32 %v283_v3, %v1542_v57  ;;  %v286_v15 = vpop.xlane.xlu2 %285 }
  0xbc   : > { %v469_v25 = vmul.f32 %v286_v15, %v1545_v58 }
  0xbd   : > { %v516_v17 = vsel %vm223_vm0, %v467_v12, 0.0  ;;  %v518_v24 = vsel %vm223_vm0, %v468_v14, 0.0 }
  0xbe   : > { %v517_v26 = vadd.f32 %v516_v17, %v515_v16  ;;  %v520_v28 = vsel %vm223_vm0, %v469_v25, 0.0 }
  0xc0   : > { %v519_v27 = vadd.f32 %v518_v24, %v517_v26 }
  0xc2   : > { %v289_v32 = vpop.xlane.xlu0 %288  ;;  %v292_v36 = vpop.xlane.xlu1 %291  ;;  %v521_v43 = vadd.f32 %v520_v28, %v519_v27 }
  0xc3   : > { %v470_v37 = vmul.f32 %v289_v32, %v1557_v6  ;;  %v471_v41 = vmul.f32 %v292_v36, %v1560_v7  ;;  %v295_v42 = vpop.xlane.xlu2 %294 }
  0xc4   : > { %v472_v51 = vmul.f32 %v295_v42, %v1563_v10 }
  0xc5   : > { %v522_v44 = vsel %vm223_vm0, %v470_v37, 0.0  ;;  %v524_v50 = vsel %vm223_vm0, %v471_v41, 0.0 }
  0xc6   : > { %v523_v52 = vadd.f32 %v522_v44, %v521_v43  ;;  %v526_v54 = vsel %vm223_vm0, %v472_v51, 0.0 }
  0xc8   : > { %v525_v53 = vadd.f32 %v524_v50, %v523_v52 }
  0xca   : > { %v298_v55 = vpop.xlane.xlu0 %297  ;;  %v301_v59 = vpop.xlane.xlu1 %300  ;;  %v527_v63 = vadd.f32 %v526_v54, %v525_v53 }
  0xcb   : > { %v473_v60 = vmul.f32 %v298_v55, %v1575_v18  ;;  %v474_v61 = vmul.f32 %v301_v59, %v1578_v19  ;;  %v304_v62 = vpop.xlane.xlu2 %303 }
  0xcc   : > { %v475_v3 = vmul.f32 %v304_v62, %v1581_v23 }
  0xcd   : > { %v528_v5 = vsel %vm223_vm0, %v473_v60, 0.0  ;;  %v530_v11 = vsel %vm223_vm0, %v474_v61, 0.0 }
  0xce   : > { %v529_v12 = vadd.f32 %v528_v5, %v527_v63  ;;  %v532_v15 = vsel %vm223_vm0, %v475_v3, 0.0 }
  0xd0   : > { %v531_v14 = vadd.f32 %v530_v11, %v529_v12 }
  0xd2   : > { %v307_v16 = vpop.xlane.xlu0 %306  ;;  %v310_v17 = vpop.xlane.xlu1 %309  ;;  %v533_v27 = vadd.f32 %v532_v15, %v531_v14 }
  0xd3   : > { %v476_v24 = vmul.f32 %v307_v16, %v1593_v33  ;;  %v477_v25 = vmul.f32 %v310_v17, %v1596_v34  ;;  %v313_v26 = vpop.xlane.xlu2 %312 }
  0xd4   : > { %v478_v36 = vmul.f32 %v313_v26, %v1599_v35 }
  0xd5   : > { %v534_v28 = vsel %vm223_vm0, %v476_v24, 0.0  ;;  %v536_v32 = vsel %vm223_vm0, %v477_v25, 0.0 }
  0xd6   : > { %v535_v37 = vadd.f32 %v534_v28, %v533_v27  ;;  %v538_v42 = vsel %vm223_vm0, %v478_v36, 0.0 }
  0xd8   : > { %v537_v41 = vadd.f32 %v536_v32, %v535_v37 }
  0xda   : > { %v316_v43 = vpop.xlane.xlu0 %315  ;;  %v319_v44 = vpop.xlane.xlu1 %318  ;;  %v539_v52 = vadd.f32 %v538_v42, %v537_v41 }
  0xdb   : > { %v479_v50 = vmul.f32 %v316_v43, %v1611_v45  ;;  %v480_v51 = vmul.f32 %v319_v44, %v1614_v46 }
  0xdd   : > { %v540_v53 = vsel %vm223_vm0, %v479_v50, 0.0  ;;  %v542_v54 = vsel %vm223_vm0, %v480_v51, 0.0 }
  0xde   : > { %v541_v55 = vadd.f32 %v540_v53, %v539_v52 }
  0xe0   : > { %v543_v59 = vadd.f32 %v542_v54, %v541_v55 }
  0xe2   : > { %v544_v60 = vrot.slane %v543_v59, 4 }
  0xe4   : > { %v545_v61 = vadd.f32 %v544_v60, %v543_v59 }
  0xe6   : > { %v546_v62 = vrot.slane %v545_v61, 2 }
  0xe8   : > { %v547_v63 = vadd.f32 %v546_v62, %v545_v61 }
  0xea   : > { %v548_v5 = vrot.slane %v547_v63, 1 }
  0xec   : > { %v1686_v11 = vadd.f32 %v548_v5, %v547_v63 }
  0xee   : > { %v653_v3 = vmul.f32 %v1686_v11, %v1431_v2  ;;  %v652_v12 = vmul.f32 %v1686_v11, %v1446_v8  ;;  %v651_v14 = vmul.f32 %v1686_v11, %v1425_v0  ;;  %v656_v24 = vmul.f32 %v1686_v11, %v1455_v13 }
  0xef   : > { %v655_v25 = vmul.f32 %v1686_v11, %v1437_v4  ;;  %v654_v26 = vmul.f32 %v1686_v11, %v1449_v9  ;;  %v659_v36 = vmul.f32 %v1686_v11, %v1473_v22  ;;  %v658_v37 = vmul.f32 %v1686_v11, %v1470_v21 }
  0xf0   : > { %v689_v15 = vsel %vm223_vm0, %v653_v3, 0.0  ;;  %v686_v16 = vsel %vm223_vm0, %v652_v12, 0.0  ;;  %v683_v17 = vsel %vm223_vm0, %v651_v14, 0.0  ;;  %v698_v27 = vsel %vm223_vm0, %v656_v24, 0.0 }
  0xf1   : > { %690 = vadd.xlane.f32.xlu1 %v689_v15  ;;  %687 = vadd.xlane.f32.xlu0 %v686_v16  ;;  %v695_v28 = vsel %vm223_vm0, %v655_v25, 0.0  ;;  %v692_v32 = vsel %vm223_vm0, %v654_v26, 0.0  ;;  %v657_v4 = vmul.f32 %v1686_v11, %v1467_v20  ;;  %v707_v41 = vsel %vm223_vm0, %v659_v36, 0.0 }
  0xf2   : > { %684 = vadd.xlane.f32.xlu2 %v683_v17  ;;  %v704_v42 = vsel %vm223_vm0, %v658_v37, 0.0  ;;  %v662_v44 = vmul.f32 %v1686_v11, %v1491_v31  ;;  %v661_v50 = vmul.f32 %v1686_v11, %v1488_v30  ;;  %v660_v51 = vmul.f32 %v1686_v11, %v1485_v29 }
  0xf3   : > { %v701_v43 = vsel %vm223_vm0, %v657_v4, 0.0  ;;  %v665_v55 = vmul.f32 %v1686_v11, %v1509_v40  ;;  %v664_v59 = vmul.f32 %v1686_v11, %v1506_v39  ;;  %v663_v60 = vmul.f32 %v1686_v11, %v1503_v38 }
  0xf4   : > { %v716_v52 = vsel %vm223_vm0, %v662_v44, 0.0  ;;  %v713_v53 = vsel %vm223_vm0, %v661_v50, 0.0  ;;  %v710_v54 = vsel %vm223_vm0, %v660_v51, 0.0  ;;  %v668_v5 = vmul.f32 %v1686_v11, %v1527_v49 }
  0xf5   : > { %v725_v61 = vsel %vm223_vm0, %v665_v55, 0.0  ;;  %v722_v62 = vsel %vm223_vm0, %v664_v59, 0.0  ;;  %v719_v63 = vsel %vm223_vm0, %v663_v60, 0.0  ;;  %v667_v3 = vmul.f32 %v1686_v11, %v1524_v48 }
  0xf6   : > { %v666_v12 = vmul.f32 %v1686_v11, %v1521_v47  ;;  %v734_v14 = vsel %vm223_vm0, %v668_v5, 0.0  ;;  %v671_v17 = vmul.f32 %v1686_v11, %v1545_v58  ;;  %v670_v24 = vmul.f32 %v1686_v11, %v1542_v57 }
  0xf7   : > { %v731_v15 = vsel %vm223_vm0, %v667_v3, 0.0  ;;  %v669_v25 = vmul.f32 %v1686_v11, %v1539_v56  ;;  %v673_v36 = vmul.f32 %v1686_v11, %v1560_v7  ;;  %v672_v37 = vmul.f32 %v1686_v11, %v1557_v6 }
  0xf8   : > { %v728_v16 = vsel %vm223_vm0, %v666_v12, 0.0  ;;  %v743_v26 = vsel %vm223_vm0, %v671_v17, 0.0  ;;  %v676_v44 = vmul.f32 %v1686_v11, %v1578_v19  ;;  %v675_v50 = vmul.f32 %v1686_v11, %v1575_v18 }
  0xf9   : > { %699 = vadd.xlane.f32.xlu1 %v698_v27  ;;  %696 = vadd.xlane.f32.xlu0 %v695_v28  ;;  %v740_v27 = vsel %vm223_vm0, %v670_v24, 0.0  ;;  %v737_v28 = vsel %vm223_vm0, %v669_v25, 0.0  ;;  %v679_v55 = vmul.f32 %v1686_v11, %v1596_v34  ;;  %v678_v59 = vmul.f32 %v1686_v11, %v1593_v33 }
  0xfa   : > { %693 = vadd.xlane.f32.xlu2 %v692_v32  ;;  %v674_v32 = vmul.f32 %v1686_v11, %v1563_v10  ;;  %v681_v5 = vmul.f32 %v1686_v11, %v1611_v45 }
  0xfc   : > { %v752_v4 = vsel %vm223_vm0, %v674_v32, 0.0  ;;  %v773_v12 = vsel %vm223_vm0, %v681_v5, 0.0 }
 0x101   : > { %708 = vadd.xlane.f32.xlu1 %v707_v41  ;;  %705 = vadd.xlane.f32.xlu0 %v704_v42  ;;  %v749_v41 = vsel %vm223_vm0, %v673_v36, 0.0  ;;  %v746_v42 = vsel %vm223_vm0, %v672_v37, 0.0 }
 0x102   : > { %702 = vadd.xlane.f32.xlu2 %v701_v43  ;;  %v677_v43 = vmul.f32 %v1686_v11, %v1581_v23 }
 0x104   : > { %v761_v51 = vsel %vm223_vm0, %v677_v43, 0.0 }
 0x109   : > { %717 = vadd.xlane.f32.xlu1 %v716_v52  ;;  %714 = vadd.xlane.f32.xlu0 %v713_v53  ;;  %v758_v52 = vsel %vm223_vm0, %v676_v44, 0.0  ;;  %v755_v53 = vsel %vm223_vm0, %v675_v50, 0.0 }
 0x10a   : > { %711 = vadd.xlane.f32.xlu2 %v710_v54  ;;  %v680_v54 = vmul.f32 %v1686_v11, %v1599_v35 }
 0x10c   : > { %v770_v60 = vsel %vm223_vm0, %v680_v54, 0.0 }
 0x111   : > { %726 = vadd.xlane.f32.xlu1 %v725_v61  ;;  %723 = vadd.xlane.f32.xlu0 %v722_v62  ;;  %v767_v61 = vsel %vm223_vm0, %v679_v55, 0.0  ;;  %v764_v62 = vsel %vm223_vm0, %v678_v59, 0.0 }
 0x112   : > { %720 = vadd.xlane.f32.xlu2 %v719_v63  ;;  %v682_v63 = vmul.f32 %v1686_v11, %v1614_v46 }
 0x114   : > { %v776_v3 = vsel %vm223_vm0, %v682_v63, 0.0 }
 0x119   : > { %735 = vadd.xlane.f32.xlu1 %v734_v14  ;;  %732 = vadd.xlane.f32.xlu0 %v731_v15  ;;  %v1012_v14 = vmul.f32 %v1686_v11, %v1686_v11 }
 0x11a   : > { %729 = vadd.xlane.f32.xlu2 %v728_v16 }
 0x11b   : > { %v1014_v15 = vsel %vm1013_vm1, %v1012_v14, 0.0 }
 0x121   : > { %744 = vadd.xlane.f32.xlu1 %v743_v26  ;;  %741 = vadd.xlane.f32.xlu0 %v740_v27 }
 0x122   : > { %738 = vadd.xlane.f32.xlu2 %v737_v28 }
 0x129   : > { %753 = vadd.xlane.f32.xlu1 %v752_v4  ;;  %750 = vadd.xlane.f32.xlu0 %v749_v41 }
 0x12a   : > { %747 = vadd.xlane.f32.xlu2 %v746_v42 }
 0x131   : > { %762 = vadd.xlane.f32.xlu1 %v761_v51  ;;  %759 = vadd.xlane.f32.xlu0 %v758_v52 }
 0x132   : > { %756 = vadd.xlane.f32.xlu2 %v755_v53 }
 0x139   : > { %771 = vadd.xlane.f32.xlu1 %v770_v60  ;;  %768 = vadd.xlane.f32.xlu0 %v767_v61 }
 0x13a   : > { %765 = vadd.xlane.f32.xlu2 %v764_v62 }
 0x141   : > { %777 = vadd.xlane.f32.xlu0 %v776_v3 }
 0x142   : > { %774 = vadd.xlane.f32.xlu2 %v773_v12 }
 0x14a   : > { %1015 = vadd.xlane.f32.xlu2 %v1014_v15 }
 0x164   : > { %v691_v16 = vpop.xlane.xlu1 %690  ;;  %v688_v17 = vpop.xlane.xlu0 %687 }
 0x165   : > { %v908_v24 = vmul.f32 %v688_v17, %v688_v17  ;;  %v685_v25 = vpop.xlane.xlu2 %684  ;;  %v909_v32 = vmul.f32 %v691_v16, %v691_v16 }
 0x166   : > { %v907_v26 = vmul.f32 %v685_v25, %v685_v25 }
 0x167   : > { %v941_v27 = vsel %vm939_vm2, %v908_v24, 0.0  ;;  %v943_v11 = vsel %vm939_vm2, %v909_v32, 0.0 }
 0x168   : > { %v940_v28 = vsel %vm939_vm2, %v907_v26, 0.0 }
 0x169   : > { %v942_v36 = vadd.f32 %v941_v27, %v940_v28 }
 0x16b   : > { %v944_v44 = vadd.f32 %v943_v11, %v942_v36 }
 0x16c   : > { %v700_v37 = vpop.xlane.xlu1 %699  ;;  %v697_v4 = vpop.xlane.xlu0 %696 }
 0x16d   : > { %v694_v41 = vpop.xlane.xlu2 %693  ;;  %v911_v42 = vmul.f32 %v697_v4, %v697_v4  ;;  %v912_v52 = vmul.f32 %v700_v37, %v700_v37 }
 0x16e   : > { %v910_v43 = vmul.f32 %v694_v41, %v694_v41 }
 0x16f   : > { %v947_v53 = vsel %vm939_vm2, %v911_v42, 0.0  ;;  %v949_v61 = vsel %vm939_vm2, %v912_v52, 0.0 }
 0x170   : > { %v945_v50 = vsel %vm939_vm2, %v910_v43, 0.0 }
 0x171   : > { %v946_v51 = vadd.f32 %v945_v50, %v944_v44 }
 0x173   : > { %v948_v54 = vadd.f32 %v947_v53, %v946_v51 }
 0x174   : > { %v709_v55 = vpop.xlane.xlu1 %708  ;;  %v706_v59 = vpop.xlane.xlu0 %705 }
 0x175   : > { %v703_v60 = vpop.xlane.xlu2 %702  ;;  %v914_v62 = vmul.f32 %v706_v59, %v706_v59  ;;  %v950_v5 = vadd.f32 %v949_v61, %v948_v54  ;;  %v915_v14 = vmul.f32 %v709_v55, %v709_v55 }
 0x176   : > { %v913_v63 = vmul.f32 %v703_v60, %v703_v60 }
 0x177   : > { %v953_v15 = vsel %vm939_vm2, %v914_v62, 0.0  ;;  %v955_v26 = vsel %vm939_vm2, %v915_v14, 0.0 }
 0x178   : > { %v951_v3 = vsel %vm939_vm2, %v913_v63, 0.0 }
 0x179   : > { %v952_v12 = vadd.f32 %v951_v3, %v950_v5 }
 0x17b   : > { %v954_v16 = vadd.f32 %v953_v15, %v952_v12 }
 0x17c   : > { %v718_v17 = vpop.xlane.xlu1 %717  ;;  %v715_v24 = vpop.xlane.xlu0 %714 }
 0x17d   : > { %v712_v25 = vpop.xlane.xlu2 %711  ;;  %v917_v27 = vmul.f32 %v715_v24, %v715_v24  ;;  %v956_v32 = vadd.f32 %v955_v26, %v954_v16  ;;  %v918_v4 = vmul.f32 %v718_v17, %v718_v17 }
 0x17e   : > { %v916_v28 = vmul.f32 %v712_v25, %v712_v25 }
 0x17f   : > { %v959_v41 = vsel %vm939_vm2, %v917_v27, 0.0  ;;  %v961_v50 = vsel %vm939_vm2, %v918_v4, 0.0 }
 0x180   : > { %v957_v36 = vsel %vm939_vm2, %v916_v28, 0.0 }
 0x181   : > { %v958_v37 = vadd.f32 %v957_v36, %v956_v32 }
 0x183   : > { %v960_v11 = vadd.f32 %v959_v41, %v958_v37 }
 0x184   : > { %v727_v42 = vpop.xlane.xlu1 %726  ;;  %v724_v43 = vpop.xlane.xlu0 %723 }
 0x185   : > { %v721_v44 = vpop.xlane.xlu2 %720  ;;  %v920_v51 = vmul.f32 %v724_v43, %v724_v43  ;;  %v962_v53 = vadd.f32 %v961_v50, %v960_v11  ;;  %v921_v59 = vmul.f32 %v727_v42, %v727_v42 }
 0x186   : > { %v919_v52 = vmul.f32 %v721_v44, %v721_v44 }
 0x187   : > { %v965_v60 = vsel %vm939_vm2, %v920_v51, 0.0  ;;  %v967_v3 = vsel %vm939_vm2, %v921_v59, 0.0 }
 0x188   : > { %v963_v54 = vsel %vm939_vm2, %v919_v52, 0.0 }
 0x189   : > { %v964_v55 = vadd.f32 %v963_v54, %v962_v53  ;;  %v1808_v54 = vperm.slane %v1428_v1, 1 }
 0x18b   : > { %v966_v61 = vadd.f32 %v965_v60, %v964_v55 }
 0x18c   : > { %v736_v62 = vpop.xlane.xlu1 %735  ;;  %v733_v63 = vpop.xlane.xlu0 %732 }
 0x18d   : > { %v730_v5 = vpop.xlane.xlu2 %729  ;;  %v923_v12 = vmul.f32 %v733_v63, %v733_v63  ;;  %v968_v15 = vadd.f32 %v967_v3, %v966_v61  ;;  %v924_v24 = vmul.f32 %v736_v62, %v736_v62 }
 0x18e   : > { %v922_v14 = vmul.f32 %v730_v5, %v730_v5 }
 0x18f   : > { %v971_v25 = vsel %vm939_vm2, %v923_v12, 0.0  ;;  %v973_v36 = vsel %vm939_vm2, %v924_v24, 0.0  ;;  %v321_v12 = vmul.f32 %v1808_v54, %v1425_v0  ;;  %v323_v24 = vmul.f32 %v1808_v54, %v1431_v2 }
 0x190   : > { %v969_v16 = vsel %vm939_vm2, %v922_v14, 0.0 }
 0x191   : > { %v970_v17 = vadd.f32 %v969_v16, %v968_v15  ;;  %v353_v16 = vsel %vm223_vm0, %v321_v12, 0.0  ;;  %v359_v0 = vsel %vm223_vm0, %v323_v24, 0.0 }
 0x192   : > { %354 = vadd.xlane.f32.xlu0 %v353_v16  ;;  %360 = vadd.xlane.f32.xlu2 %v359_v0  ;;  %v333_v0 = vmul.f32 %v1808_v54, %v1503_v38 }
 0x193   : > { %v972_v26 = vadd.f32 %v971_v25, %v970_v17 }
 0x194   : > { %v745_v27 = vpop.xlane.xlu1 %744  ;;  %v742_v28 = vpop.xlane.xlu0 %741 }
 0x195   : > { %v739_v32 = vpop.xlane.xlu2 %738  ;;  %v926_v37 = vmul.f32 %v742_v28, %v742_v28  ;;  %v974_v41 = vadd.f32 %v973_v36, %v972_v26  ;;  %v927_v43 = vmul.f32 %v745_v27, %v745_v27  ;;  %v324_v28 = vmul.f32 %v1808_v54, %v1449_v9 }
 0x196   : > { %v925_v4 = vmul.f32 %v739_v32, %v739_v32 }
 0x197   : > { %v977_v44 = vsel %vm939_vm2, %v926_v37, 0.0  ;;  %v979_v55 = vsel %vm939_vm2, %v927_v43, 0.0 }
 0x198   : > { %v975_v11 = vsel %vm939_vm2, %v925_v4, 0.0 }
 0x199   : > { %v976_v42 = vadd.f32 %v975_v11, %v974_v41  ;;  %v362_v11 = vsel %vm223_vm0, %v324_v28, 0.0 }
 0x19a   : > { %363 = vadd.xlane.f32.xlu0 %v362_v11  ;;  %v1855_v11 = vld [vmem:[%s1417_s15 + $0x20] sm:$0xff] }
 0x19b   : > { %v978_v50 = vadd.f32 %v977_v44, %v976_v42  ;;  %v326_v44 = vmul.f32 %v1808_v54, %v1455_v13 }
 0x19c   : > { %v754_v51 = vpop.xlane.xlu1 %753  ;;  %v751_v52 = vpop.xlane.xlu0 %750 }
 0x19d   : > { %v748_v53 = vpop.xlane.xlu2 %747  ;;  %v929_v59 = vmul.f32 %v751_v52, %v751_v52  ;;  %v980_v61 = vadd.f32 %v979_v55, %v978_v50  ;;  %v930_v5 = vmul.f32 %v754_v51, %v754_v51  ;;  %v327_v52 = vmul.f32 %v1808_v54, %v1467_v20 }
 0x19e   : > { %v928_v60 = vmul.f32 %v748_v53, %v748_v53  ;;  %v329_v20 = vmul.f32 %v1808_v54, %v1473_v22 }
 0x19f   : > { %v983_v3 = vsel %vm939_vm2, %v929_v59, 0.0  ;;  %v985_v25 = vsel %vm939_vm2, %v930_v5, 0.0  ;;  %v368_v59 = vsel %vm223_vm0, %v326_v44, 0.0  ;;  %v371_v13 = vsel %vm223_vm0, %v327_v52, 0.0 }
 0x1a0   : > { %v981_v62 = vsel %vm939_vm2, %v928_v60, 0.0  ;;  %369 = vadd.xlane.f32.xlu2 %v368_v59  ;;  %v377_v24 = vsel %vm223_vm0, %v329_v20, 0.0  ;;  %v339_v44 = vmul.f32 %v1808_v54, %v1539_v56  ;;  %v349_v20 = vmul.f32 %v1808_v54, %v1596_v34 }
 0x1a1   : > { %v982_v63 = vadd.f32 %v981_v62, %v980_v61 }
 0x1a2   : > { %372 = vadd.xlane.f32.xlu0 %v371_v13  ;;  %v350_v13 = vmul.f32 %v1808_v54, %v1599_v35 }
 0x1a3   : > { %v984_v14 = vadd.f32 %v983_v3, %v982_v63 }
 0x1a4   : > { %v760_v15 = vpop.xlane.xlu0 %759  ;;  %v763_v1 = vpop.xlane.xlu1 %762 }
 0x1a5   : > { %v757_v17 = vpop.xlane.xlu2 %756  ;;  %v932_v26 = vmul.f32 %v760_v15, %v760_v15  ;;  %v986_v32 = vadd.f32 %v985_v25, %v984_v14  ;;  %v933_v4 = vmul.f32 %v763_v1, %v763_v1  ;;  %v330_v1 = vmul.f32 %v1808_v54, %v1485_v29 }
 0x1a6   : > { %v931_v27 = vmul.f32 %v757_v17, %v757_v17  ;;  %v322_v29 = vmul.f32 %v1808_v54, %v1446_v8  ;;  %v325_v8 = vmul.f32 %v1855_v11, %v1808_v54 }
 0x1a7   : > { %v989_v41 = vsel %vm939_vm2, %v932_v26, 0.0  ;;  %v991_v9 = vsel %vm939_vm2, %v933_v4, 0.0  ;;  %v380_v28 = vsel %vm223_vm0, %v330_v1, 0.0  ;;  %v389_v4 = vsel %vm223_vm0, %v333_v0, 0.0 }
 0x1a8   : > { %v987_v36 = vsel %vm939_vm2, %v931_v27, 0.0  ;;  %378 = vadd.xlane.f32.xlu2 %v377_v24 }
 0x1a9   : > { %v988_v37 = vadd.f32 %v987_v36, %v986_v32  ;;  %v332_v32 = vmul.f32 %v1808_v54, %v1491_v31  ;;  %v336_v31 = vmul.f32 %v1808_v54, %v1521_v47 }
 0x1aa   : > { %381 = vadd.xlane.f32.xlu0 %v380_v28 }
 0x1ab   : > { %v990_v2 = vadd.f32 %v989_v41, %v988_v37  ;;  %v386_v36 = vsel %vm223_vm0, %v332_v32, 0.0  ;;  %v356_v37 = vsel %vm223_vm0, %v322_v29, 0.0  ;;  %v335_v41 = vmul.f32 %v1808_v54, %v1509_v40  ;;  %v1932_v29 = vld [vmem:[%s1417_s15] sm:$0xff] }
 0x1ac   : > { %v769_v42 = vpop.xlane.xlu0 %768  ;;  %v772_v53 = vpop.xlane.xlu1 %771  ;;  %v338_v40 = vmul.f32 %v1808_v54, %v1527_v49  ;;  %v331_v49 = vmul.f32 %v1808_v54, %v1488_v30  ;;  %v345_v30 = vmul.f32 %v1808_v54, %v1575_v18 }
 0x1ad   : > { %v766_v43 = vpop.xlane.xlu2 %765  ;;  %v935_v50 = vmul.f32 %v769_v42, %v769_v42  ;;  %v992_v55 = vadd.f32 %v991_v9, %v990_v2  ;;  %v936_v62 = vmul.f32 %v772_v53, %v772_v53  ;;  %v395_v38 = vsel %vm223_vm0, %v335_v41, 0.0 }
 0x1ae   : > { %v934_v51 = vmul.f32 %v766_v43, %v766_v43  ;;  %v365_v2 = vsel %vm223_vm0, %v325_v8, 0.0  ;;  %v398_v42 = vsel %vm223_vm0, %v336_v31, 0.0  ;;  %v328_v43 = vmul.f32 %v1808_v54, %v1470_v21 }
 0x1af   : > { %v995_v63 = vsel %vm939_vm2, %v935_v50, 0.0  ;;  %v997_v14 = vsel %vm939_vm2, %v936_v62, 0.0  ;;  %v404_v47 = vsel %vm223_vm0, %v338_v40, 0.0  ;;  %v407_v50 = vsel %vm223_vm0, %v339_v44, 0.0 }
 0x1b0   : > { %v993_v60 = vsel %vm939_vm2, %v934_v51, 0.0  ;;  %387 = vadd.xlane.f32.xlu2 %v386_v36  ;;  %v374_v9 = vsel %vm223_vm0, %v328_v43, 0.0  ;;  %v341_v51 = vmul.f32 %v1808_v54, %v1545_v58  ;;  %v342_v21 = vmul.f32 %v1808_v54, %v1557_v6 }
 0x1b1   : > { %v994_v61 = vadd.f32 %v993_v60, %v992_v55  ;;  %v383_v52 = vsel %vm223_vm0, %v331_v49, 0.0  ;;  %v344_v55 = vmul.f32 %v1808_v54, %v1563_v10  ;;  %v334_v58 = vmul.f32 %v1808_v54, %v1506_v39 }
 0x1b2   : > { %390 = vadd.xlane.f32.xlu0 %v389_v4  ;;  %v413_v56 = vsel %vm223_vm0, %v341_v51, 0.0  ;;  %v416_v53 = vsel %vm223_vm0, %v342_v21, 0.0  ;;  %v425_v60 = vsel %vm223_vm0, %v345_v30, 0.0  ;;  %v337_v10 = vmul.f32 %v1808_v54, %v1524_v48 }
 0x1b3   : > { %v996_v5 = vadd.f32 %v995_v63, %v994_v61  ;;  %v422_v6 = vsel %vm223_vm0, %v344_v55, 0.0  ;;  %v392_v59 = vsel %vm223_vm0, %v334_v58, 0.0  ;;  %v347_v61 = vmul.f32 %v1808_v54, %v1581_v23 }
 0x1b4   : > { %v778_v3 = vpop.xlane.xlu0 %777  ;;  %v348_v39 = vmul.f32 %v1808_v54, %v1593_v33  ;;  %v401_v62 = vsel %vm223_vm0, %v337_v10, 0.0  ;;  %v340_v23 = vmul.f32 %v1808_v54, %v1542_v57  ;;  %v351_v48 = vmul.f32 %v1808_v54, %v1611_v45  ;;  %v1975_v10 = vld [vmem:[%s1417_s15 + $0x30] sm:$0xff] }
 0x1b5   : > { %v775_v12 = vpop.xlane.xlu2 %774  ;;  %v938_v15 = vmul.f32 %v778_v3, %v778_v3  ;;  %v998_v17 = vadd.f32 %v997_v14, %v996_v5  ;;  %v431_v18 = vsel %vm223_vm0, %v347_v61, 0.0  ;;  %v440_v33 = vsel %vm223_vm0, %v350_v13, 0.0 }
 0x1b6   : > { %v937_v16 = vmul.f32 %v775_v12, %v775_v12  ;;  %v434_v63 = vsel %vm223_vm0, %v348_v39, 0.0  ;;  %v410_v5 = vsel %vm223_vm0, %v340_v23, 0.0  ;;  %v443_v3 = vsel %vm223_vm0, %v351_v48, 0.0  ;;  %v1983_v23 = vld [vmem:[%s1417_s15 + $0x40] sm:$0xff] }
 0x1b7   : > { %v1001_v27 = vsel %vm939_vm2, %v938_v15, 0.0  ;;  %v343_v12 = vmul.f32 %v1808_v54, %v1560_v7  ;;  %v346_v57 = vmul.f32 %v1808_v54, %v1578_v19  ;;  %v437_v14 = vsel %vm223_vm0, %v349_v20, 0.0  ;;  %v1999_v20 = vld [vmem:[%s1417_s15 + $0x48] sm:$0xff] }
 0x1b8   : > { %v999_v25 = vsel %vm939_vm2, %v937_v16, 0.0  ;;  %396 = vadd.xlane.f32.xlu2 %v395_v38  ;;  %v352_v15 = vmul.f32 %v1808_v54, %v1614_v46  ;;  %v1946_v38 = vld [vmem:[%s1417_s15 + $0x8] sm:$0xff] }
 0x1b9   : > { %v1000_v26 = vadd.f32 %v999_v25, %v998_v17  ;;  %v419_v35 = vsel %vm223_vm0, %v343_v12, 0.0  ;;  %v428_v45 = vsel %vm223_vm0, %v346_v57, 0.0 }
 0x1ba   : > { %399 = vadd.xlane.f32.xlu0 %v398_v42  ;;  %v446_v7 = vsel %vm223_vm0, %v352_v15, 0.0 }
 0x1bb   : > { %v1002_v22 = vadd.f32 %v1001_v27, %v1000_v26 }
 0x1bd   : > { %1003 = vadd.xlane.f32.xlu1 %v1002_v22  ;;  %v1016_v16 = vpop.xlane.xlu2 %1015 }
 0x1be   : > { %v1017_v24 = vrot.slane %v1016_v16, 4 }
 0x1c0   : > { %405 = vadd.xlane.f32.xlu2 %v404_v47  ;;  %v1018_v34 = vadd.f32 %v1017_v24, %v1016_v16 }
 0x1c2   : > { %408 = vadd.xlane.f32.xlu0 %v407_v50  ;;  %v1019_v26 = vrot.slane %v1018_v34, 2 }
 0x1c4   : > { %v1020_v22 = vadd.f32 %v1019_v26, %v1018_v34  ;;  %v2007_v34 = vld [vmem:[%s1417_s15 + $0x58] sm:$0xff] }
 0x1c5   : > { %357 = vadd.xlane.f32.xlu1 %v356_v37  ;;  %v1939_v37 = vld [vmem:[%s1417_s15 + $0x10] sm:$0xff] }
 0x1c6   : > { %v1021_v31 = vrot.slane %v1020_v22, 1 }
 0x1c8   : > { %414 = vadd.xlane.f32.xlu2 %v413_v56  ;;  %v1022_v21 = vadd.f32 %v1021_v31, %v1020_v22 }
 0x1ca   : > { %417 = vadd.xlane.f32.xlu0 %v416_v53  ;;  %v1962_v53 = vld [vmem:[%s1417_s15 + $0x28] sm:$0xff] }
 0x1cd   : > { %366 = vadd.xlane.f32.xlu1 %v365_v2 }
 0x1d0   : > { %423 = vadd.xlane.f32.xlu2 %v422_v6 }
 0x1d2   : > { %426 = vadd.xlane.f32.xlu0 %v425_v60 }
 0x1d5   : > { %375 = vadd.xlane.f32.xlu1 %v374_v9  ;;  %v1956_v9 = vld [vmem:[%s1417_s15 + $0x18] sm:$0xff] }
 0x1d8   : > { %432 = vadd.xlane.f32.xlu2 %v431_v18 }
 0x1da   : > { %435 = vadd.xlane.f32.xlu0 %v434_v63 }
 0x1dd   : > { %384 = vadd.xlane.f32.xlu1 %v383_v52 }
 0x1e0   : > { %441 = vadd.xlane.f32.xlu2 %v440_v33 }
 0x1e2   : > { %444 = vadd.xlane.f32.xlu0 %v443_v3 }
 0x1e5   : > { %393 = vadd.xlane.f32.xlu1 %v392_v59 }
 0x1ed   : > { %402 = vadd.xlane.f32.xlu1 %v401_v62 }
 0x1f5   : > { %411 = vadd.xlane.f32.xlu1 %v410_v5  ;;  %v1990_v5 = vld [vmem:[%s1417_s15 + $0x38] sm:$0xff] }
 0x1fd   : > { %420 = vadd.xlane.f32.xlu1 %v419_v35 }
 0x205   : > { %429 = vadd.xlane.f32.xlu1 %v428_v45  ;;  %v1921_v1 = vpop.xlane.xlu0 %354  ;;  %v1923_v19 = vpop.xlane.xlu2 %360 }
 0x206   : > { %v550_v0 = vmul.f32 %v1932_v29, %v1921_v1  ;;  %v552_v4 = vmul.f32 %v1939_v37, %v1923_v19 }
 0x208   : > { %v582_v40 = vsel %vm223_vm0, %v550_v0, 0.0  ;;  %v585_v47 = vsel %vm223_vm0, %v552_v4, 0.0  ;;  %v2021_v4 = vld [vmem:[%s1417_s15 + $0x60] sm:$0xff] }
 0x20d   : > { %438 = vadd.xlane.f32.xlu1 %v437_v14  ;;  %v1925_v17 = vpop.xlane.xlu0 %363 }
 0x20e   : > { %v553_v50 = vmul.f32 %v1956_v9, %v1925_v17 }
 0x210   : > { %v587_v52 = vsel %vm223_vm0, %v553_v50, 0.0 }
 0x213   : > { %v1927_v25 = vpop.xlane.xlu2 %369 }
 0x214   : > { %v555_v55 = vmul.f32 %v1962_v53, %v1927_v25 }
 0x215   : > { %447 = vadd.xlane.f32.xlu1 %v446_v7  ;;  %v1929_v46 = vpop.xlane.xlu0 %372 }
 0x216   : > { %v591_v61 = vsel %vm223_vm0, %v555_v55, 0.0  ;;  %v556_v39 = vmul.f32 %v1975_v10, %v1929_v46 }
 0x218   : > { %v593_v13 = vsel %vm223_vm0, %v556_v39, 0.0 }
 0x21b   : > { %v1936_v36 = vpop.xlane.xlu2 %378 }
 0x21c   : > { %v558_v48 = vmul.f32 %v1983_v23, %v1936_v36 }
 0x21d   : > { %v1951_v43 = vpop.xlane.xlu0 %381 }
 0x21e   : > { %v597_v45 = vsel %vm223_vm0, %v558_v48, 0.0  ;;  %v559_v14 = vmul.f32 %v1999_v20, %v1951_v43 }
 0x220   : > { %v599_v24 = vsel %vm223_vm0, %v559_v14, 0.0 }
 0x223   : > { %v1968_v30 = vpop.xlane.xlu2 %387 }
 0x224   : > { %v561_v26 = vmul.f32 %v2007_v34, %v1968_v30 }
 0x225   : > { %v1979_v62 = vpop.xlane.xlu0 %390 }
 0x226   : > { %2415 = vst [vmem:[#allocation2_spill] sm:$0xff] %v1979_v62  ;;  %v603_v0 = vsel %vm223_vm0, %v561_v26, 0.0 }
 0x22b   : > { %v1994_v35 = vpop.xlane.xlu2 %396 }
 0x22c   : > { %2416 = vst [vmem:[#allocation3_spill] sm:$0xff] %v1994_v35 }
 0x22d   : > { %v2003_v16 = vpop.xlane.xlu0 %399 }
 0x22e   : > { %2417 = vst [vmem:[#allocation4_spill] sm:$0xff] %v2003_v16 }
 0x230   : > { %v1004_v27 = vpop.xlane.xlu1 %1003 }
 0x231   : > { %v1005_v54 = vrot.slane %v1004_v27, 4 }
 0x233   : > { %v1006_v28 = vadd.f32 %v1005_v54, %v1004_v27  ;;  %v2014_v54 = vld [vmem:[%s1417_s15 + $0x50] sm:$0xff] }
 0x235   : > { %v1007_v32 = vrot.slane %v1006_v28, 2 }
 0x237   : > { %v1008_v41 = vadd.f32 %v1007_v32, %v1006_v28 }
 0x238   : > { %v1943_v8 = vpop.xlane.xlu1 %357 }
 0x239   : > { %v551_v2 = vmul.f32 %v1946_v38, %v1943_v8  ;;  %v1009_v42 = vrot.slane %v1008_v41, 1 }
 0x23b   : > { %v583_v44 = vsel %vm223_vm0, %v551_v2, 0.0  ;;  %v1010_v51 = vadd.f32 %v1009_v42, %v1008_v41  ;;  %v562_v41 = vmul.f32 %v2021_v4, %v1979_v62  ;;  %v2025_v2 = vpop.xlane.xlu2 %405 }
 0x23c   : > { %v584_v49 = vadd.f32 %v583_v44, %v582_v40  ;;  %2418 = vst [vmem:[#allocation5_spill] sm:$0xff] %v2025_v2  ;;  %v2029_v44 = vld [vmem:[%s1417_s15 + $0x70] sm:$0xff] }
 0x23d   : > { %1322 = vpush %v1010_v51  ;;  %v605_v40 = vsel %vm223_vm0, %v562_v41, 0.0  ;;  %v2035_v51 = vpop.xlane.xlu0 %408 }
 0x23e   : > { %v586_v56 = vadd.f32 %v585_v47, %v584_v49  ;;  %1324 = vpush %v1022_v21  ;;  %v564_v47 = vmul.f32 %v2029_v44, %v1994_v35  ;;  %v2038_v49 = vld [vmem:[%s1417_s15 + $0x68] sm:$0xff] }
 0x23f   : > { %2420 = vst [vmem:[#allocation7_spill] sm:$0xff] %v2035_v51 }
 0x240   : > { %v1966_v58 = vpop.xlane.xlu1 %366  ;;  %v588_v59 = vadd.f32 %v587_v52, %v586_v56  ;;  %v609_v55 = vsel %vm223_vm0, %v564_v47, 0.0 }
 0x241   : > { %v554_v6 = vmul.f32 %v1855_v11, %v1966_v58 }
 0x243   : > { %v589_v60 = vsel %vm223_vm0, %v554_v6, 0.0  ;;  %v2045_v6 = vld [vmem:[%s1417_s15 + $0x78] sm:$0xff]  ;;  %v2049_v39 = vpop.xlane.xlu2 %414 }
 0x244   : > { %v590_v18 = vadd.f32 %v589_v60, %v588_v59  ;;  %v565_v59 = vmul.f32 %v2045_v6, %v2003_v16  ;;  %2421 = vst [vmem:[#allocation8_spill] sm:$0xff] %v2049_v39 }
 0x246   : > { %v592_v63 = vadd.f32 %v591_v61, %v590_v18  ;;  %v611_v18 = vsel %vm223_vm0, %v565_v59, 0.0 }
 0x248   : > { %v1987_v33 = vpop.xlane.xlu1 %375  ;;  %v594_v12 = vadd.f32 %v593_v13, %v592_v63  ;;  %v2053_v63 = vld [vmem:[%s1417_s15 + $0x88] sm:$0xff] }
 0x249   : > { %v557_v3 = vmul.f32 %v1990_v5, %v1987_v33  ;;  %v567_v13 = vmul.f32 %v2053_v63, %v2025_v2 }
 0x24b   : > { %v595_v57 = vsel %vm223_vm0, %v557_v3, 0.0  ;;  %v2060_v3 = vld [vmem:[%s1417_s15 + $0x80] sm:$0xff] }
 0x24c   : > { %v596_v15 = vadd.f32 %v595_v57, %v594_v12 }
 0x24e   : > { %v598_v7 = vadd.f32 %v597_v45, %v596_v15  ;;  %v2064_v45 = vpop.xlane.xlu0 %417  ;;  %v615_v15 = vsel %vm223_vm0, %v567_v13, 0.0  ;;  %v2101_v13 = vld [vmem:[%s1417_s15 + $0xb8] sm:$0xff] }
 0x24f   : > { %2423 = vst [vmem:[#allocation10_spill] sm:$0xff] %v2064_v45 }
 0x250   : > { %v2011_v27 = vpop.xlane.xlu1 %384  ;;  %v600_v22 = vadd.f32 %v599_v24, %v598_v7  ;;  %v2069_v7 = vld [vmem:[%s1417_s15 + $0x90] sm:$0xff] }
 0x251   : > { %v560_v28 = vmul.f32 %v2014_v54, %v2011_v27  ;;  %v568_v24 = vmul.f32 %v2069_v7, %v2035_v51 }
 0x253   : > { %v601_v32 = vsel %vm223_vm0, %v560_v28, 0.0 }
 0x254   : > { %v602_v31 = vadd.f32 %v601_v32, %v600_v22  ;;  %v617_v22 = vsel %vm223_vm0, %v568_v24, 0.0  ;;  %v2075_v32 = vld [vmem:[%s1417_s15 + $0xa0] sm:$0xff] }
 0x256   : > { %v604_v42 = vadd.f32 %v603_v0, %v602_v31  ;;  %v570_v0 = vmul.f32 %v2075_v32, %v2049_v39  ;;  %v2081_v31 = vpop.xlane.xlu2 %423 }
 0x257   : > { %2425 = vst [vmem:[#allocation12_spill] sm:$0xff] %v2081_v31 }
 0x258   : > { %v2033_v50 = vpop.xlane.xlu1 %393  ;;  %v606_v56 = vadd.f32 %v605_v40, %v604_v42  ;;  %v2084_v42 = vld [vmem:[%s1417_s15 + $0x98] sm:$0xff] }
 0x259   : > { %2419 = vst [vmem:[#allocation6_spill] sm:$0xff] %v2033_v50  ;;  %v563_v21 = vmul.f32 %v2038_v49, %v2033_v50 }
 0x25b   : > { %v607_v52 = vsel %vm223_vm0, %v563_v21, 0.0 }
 0x25c   : > { %v608_v60 = vadd.f32 %v607_v52, %v606_v56  ;;  %v621_v56 = vsel %vm223_vm0, %v570_v0, 0.0  ;;  %v2091_v52 = vld [vmem:[%s1417_s15 + $0xa8] sm:$0xff] }
 0x25e   : > { %v610_v61 = vadd.f32 %v609_v55, %v608_v60  ;;  %v571_v55 = vmul.f32 %v2091_v52, %v2064_v45  ;;  %v2095_v60 = vpop.xlane.xlu0 %426 }
 0x25f   : > { %2426 = vst [vmem:[#allocation13_spill] sm:$0xff] %v2095_v60 }
 0x260   : > { %v2057_v48 = vpop.xlane.xlu1 %402  ;;  %v612_v57 = vadd.f32 %v611_v18, %v610_v61  ;;  %v623_v18 = vsel %vm223_vm0, %v571_v55, 0.0 }
 0x261   : > { %2422 = vst [vmem:[#allocation9_spill] sm:$0xff] %v2057_v48  ;;  %v566_v12 = vmul.f32 %v2060_v3, %v2057_v48 }
 0x263   : > { %v613_v14 = vsel %vm223_vm0, %v566_v12, 0.0  ;;  %v573_v12 = vmul.f32 %v2101_v13, %v2081_v31  ;;  %v2132_v31 = vld [vmem:[%s1417_s15 + $0xc8] sm:$0xff] }
 0x264   : > { %v614_v26 = vadd.f32 %v613_v14, %v612_v57  ;;  %v2108_v14 = vld [vmem:[%s1417_s15 + $0xb0] sm:$0xff] }
 0x265   : > { %v627_v0 = vsel %vm223_vm0, %v573_v12, 0.0 }
 0x266   : > { %v616_v28 = vadd.f32 %v615_v15, %v614_v26  ;;  %v2121_v55 = vpop.xlane.xlu0 %435 }
 0x267   : > { %2429 = vst [vmem:[#allocation16_spill] sm:$0xff] %v2121_v55 }
 0x268   : > { %v2079_v41 = vpop.xlane.xlu1 %411  ;;  %v618_v47 = vadd.f32 %v617_v22, %v616_v28  ;;  %v2112_v28 = vpop.xlane.xlu2 %432 }
 0x269   : > { %2424 = vst [vmem:[#allocation11_spill] sm:$0xff] %v2079_v41  ;;  %v569_v40 = vmul.f32 %v2084_v42, %v2079_v41 }
 0x26a   : > { %2428 = vst [vmem:[#allocation15_spill] sm:$0xff] %v2112_v28 }
 0x26b   : > { %v619_v21 = vsel %vm223_vm0, %v569_v40, 0.0  ;;  %v2117_v40 = vld [vmem:[%s1417_s15 + $0xc0] sm:$0xff] }
 0x26c   : > { %v620_v59 = vadd.f32 %v619_v21, %v618_v47  ;;  %v574_v47 = vmul.f32 %v2117_v40, %v2095_v60 }
 0x26e   : > { %v622_v61 = vadd.f32 %v621_v56, %v620_v59  ;;  %s2097_s19 = spop %1322  ;;  %v629_v59 = vsel %vm223_vm0, %v574_v47, 0.0 }
 0x26f   : > { %s1325_s20 = spop %1324 }
 0x270   : > { %s1024_s21 = sadd.f32 1e-30, %s1325_s20  ;;  %v2105_v57 = vpop.xlane.xlu1 %420  ;;  %v624_v24 = vadd.f32 %v623_v18, %v622_v61  ;;  %v2125_v61 = vld [vmem:[%s1417_s15 + $0xd0] sm:$0xff]  ;;  %v2143_v39 = vpop.xlane.xlu2 %441 }
 0x271   : > { %2427 = vst [vmem:[#allocation14_spill] sm:$0xff] %v2105_v57  ;;  %v572_v15 = vmul.f32 %v2108_v14, %v2105_v57  ;;  %v576_v18 = vmul.f32 %v2125_v61, %v2112_v28 }
 0x272   : > { %v1025_v26 = vstv %s1024_s21  ;;  %2431 = vst [vmem:[#allocation18_spill] sm:$0xff] %v2143_v39 }
 0x273   : > { %1342 = vrcp.f32 %v1025_v26  ;;  %v625_v22 = vsel %vm223_vm0, %v572_v15, 0.0  ;;  %v633_v47 = vsel %vm223_vm0, %v576_v18, 0.0  ;;  %v1037_v41 = vand.u32 2147483648, %v1025_v26 }
 0x274   : > { %v626_v21 = vadd.f32 %v625_v22, %v624_v24  ;;  %v1035_v2 = vand.u32 2147483647, %v1025_v26  ;;  %vm1031_vm4 = vweird.f32 %v1025_v26 }
 0x276   : > { %v628_v56 = vadd.f32 %v627_v0, %v626_v21  ;;  %v2139_v21 = vld [vmem:[%s1417_s15 + $0xd8] sm:$0xff]  ;;  %vm1036_vm6 = vcmp.eq.f32.partialorder %v1035_v2, 8.507059e+37 }
 0x277   : > { %v577_v28 = vmul.f32 %v2139_v21, %v2121_v55 }
 0x278   : > { %v2129_v15 = vpop.xlane.xlu1 %429  ;;  %v630_v22 = vadd.f32 %v629_v59, %v628_v56 }
 0x279   : > { %2430 = vst [vmem:[#allocation17_spill] sm:$0xff] %v2129_v15  ;;  %v1343_v12 = vpop.eup %1342  ;;  %v575_v57 = vmul.f32 %v2132_v31, %v2129_v15  ;;  %v635_v56 = vsel %vm223_vm0, %v577_v28, 0.0 }
 0x27a   : > { %v1027_v24 = vmul.f32 %v1343_v12, %v1025_v26  ;;  %vm1032_vm3 = vweird.f32 %v1343_v12 }
 0x27b   : > { %v631_v0 = vsel %vm223_vm0, %v575_v57, 0.0  ;;  %v2147_v57 = vld [vmem:[%s1417_s15 + $0xe8] sm:$0xff]  ;;  %vm1033_vm5 = vmor %vm1031_vm4, %vm1032_vm3 }
 0x27c   : > { %v1028_v60 = vsub.f32 1.0, %v1027_v24  ;;  %v632_v45 = vadd.f32 %v631_v0, %v630_v22  ;;  %v579_v59 = vmul.f32 %v2147_v57, %v2143_v39  ;;  %v2153_v24 = vpop.xlane.xlu0 %444  ;;  %v2156_v22 = vld [vmem:[%s1417_s15 + $0xe0] sm:$0xff] }
 0x27e   : > { %v634_v51 = vadd.f32 %v633_v47, %v632_v45  ;;  %v1029_v15 = vmul.f32 %v1343_v12, %v1028_v60  ;;  %v1038_v60 = vor.u32 1.1754944e-38, %v1037_v41  ;;  %v639_v39 = vsel %vm223_vm0, %v579_v59, 0.0 }
 0x280   : > { %v2151_v18 = vpop.xlane.xlu1 %438  ;;  %v1030_v55 = vadd.f32 %v1343_v12, %v1029_v15  ;;  %v636_v28 = vadd.f32 %v635_v56, %v634_v51  ;;  %v2163_v15 = vld [vmem:[%s1417_s15 + $0xf0] sm:$0xff]  ;;  %v2171_v51 = vld [vmem:[%s1417_s15 + $0xf8] sm:$0xff] }
 0x281   : > { %v578_v45 = vmul.f32 %v2156_v22, %v2151_v18  ;;  %v580_v26 = vmul.f32 %v2163_v15, %v2153_v24 }
 0x282   : > { %v1034_v0 = vsel %vm1033_vm5, %v1343_v12, %v1030_v55 }
 0x283   : > { %v637_v47 = vsel %vm223_vm0, %v578_v45, 0.0  ;;  %v1039_v16 = vsel %vm1036_vm6, %v1038_v60, %v1034_v0  ;;  %v641_v62 = vsel %vm223_vm0, %v580_v26, 0.0 }
 0x284   : > { %v638_v48 = vadd.f32 %v637_v47, %v636_v28  ;;  %1326 = vpush %v1039_v16 }
 0x286   : > { %v640_v35 = vadd.f32 %v639_v39, %v638_v48 }
 0x288   : > { %v2168_v50 = vpop.xlane.xlu1 %447  ;;  %v642_v41 = vadd.f32 %v641_v62, %v640_v35 }
 0x289   : > { %v581_v2 = vmul.f32 %v2171_v51, %v2168_v50 }
 0x28b   : > { %v643_v55 = vsel %vm223_vm0, %v581_v2, 0.0 }
 0x28c   : > { %v644_v12 = vadd.f32 %v643_v55, %v642_v41 }
 0x28e   : > { %v645_v56 = vrot.slane %v644_v12, 4 }
 0x290   : > { %v646_v59 = vadd.f32 %v645_v56, %v644_v12 }
 0x292   : > { %v647_v45 = vrot.slane %v646_v59, 2 }
 0x294   : > { %v648_v60 = vadd.f32 %v647_v45, %v646_v59 }
 0x296   : > { %v649_v28 = vrot.slane %v648_v60, 1 }
 0x298   : > { %v2176_v16 = vadd.f32 %v649_v28, %v648_v60 }
 0x29a   : > { %v781_v39 = vmul.f32 %v1939_v37, %v2176_v16  ;;  %v780_v48 = vmul.f32 %v1946_v38, %v2176_v16  ;;  %v779_v0 = vmul.f32 %v1932_v29, %v2176_v16  ;;  %v784_v26 = vmul.f32 %v1962_v53, %v2176_v16 }
 0x29b   : > { %v783_v37 = vmul.f32 %v1855_v11, %v2176_v16  ;;  %v782_v38 = vmul.f32 %v1956_v9, %v2176_v16  ;;  %v787_v55 = vmul.f32 %v1983_v23, %v2176_v16  ;;  %v786_v53 = vmul.f32 %v1990_v5, %v2176_v16 }
 0x29c   : > { %v817_v62 = vsel %vm223_vm0, %v781_v39, 0.0  ;;  %v814_v35 = vsel %vm223_vm0, %v780_v48, 0.0  ;;  %v811_v47 = vsel %vm223_vm0, %v779_v0, 0.0  ;;  %v826_v29 = vsel %vm223_vm0, %v784_v26, 0.0 }
 0x29d   : > { %818 = vadd.xlane.f32.xlu1 %v817_v62  ;;  %815 = vadd.xlane.f32.xlu0 %v814_v35  ;;  %v823_v2 = vsel %vm223_vm0, %v783_v37, 0.0  ;;  %v820_v41 = vsel %vm223_vm0, %v782_v38, 0.0  ;;  %v785_v11 = vmul.f32 %v1975_v10, %v2176_v16  ;;  %v835_v9 = vsel %vm223_vm0, %v787_v55, 0.0  ;;  %v1378_v37 = vld [vmem:[%s1422_s18] sm:$0x3] }
 0x29e   : > { %812 = vadd.xlane.f32.xlu2 %v811_v47  ;;  %v832_v12 = vsel %vm223_vm0, %v786_v53, 0.0  ;;  %v790_v59 = vmul.f32 %v2007_v34, %v2176_v16  ;;  %v789_v23 = vmul.f32 %v2014_v54, %v2176_v16  ;;  %v788_v5 = vmul.f32 %v1999_v20, %v2176_v16 }
 0x29f   : > { %v829_v56 = vsel %vm223_vm0, %v785_v11, 0.0  ;;  %v793_v28 = vmul.f32 %v2029_v44, %v2176_v16  ;;  %v792_v34 = vmul.f32 %v2038_v49, %v2176_v16  ;;  %v791_v20 = vmul.f32 %v2021_v4, %v2176_v16 }
 0x2a0   : > { %v844_v10 = vsel %vm223_vm0, %v790_v59, 0.0  ;;  %v841_v45 = vsel %vm223_vm0, %v789_v23, 0.0  ;;  %v838_v60 = vsel %vm223_vm0, %v788_v5, 0.0  ;;  %v796_v49 = vmul.f32 %v2053_v63, %v2176_v16 }
 0x2a1   : > { %v853_v54 = vsel %vm223_vm0, %v793_v28, 0.0  ;;  %v850_v48 = vsel %vm223_vm0, %v792_v34, 0.0  ;;  %v847_v44 = vsel %vm223_vm0, %v791_v20, 0.0  ;;  %v795_v4 = vmul.f32 %v2060_v3, %v2176_v16 }
 0x2a2   : > { %v794_v62 = vmul.f32 %v2045_v6, %v2176_v16  ;;  %v862_v35 = vsel %vm223_vm0, %v796_v49, 0.0  ;;  %v799_v63 = vmul.f32 %v2075_v32, %v2176_v16  ;;  %v798_v3 = vmul.f32 %v2084_v42, %v2176_v16 }
 0x2a3   : > { %v859_v47 = vsel %vm223_vm0, %v795_v4, 0.0  ;;  %v797_v6 = vmul.f32 %v2069_v7, %v2176_v16  ;;  %v801_v32 = vmul.f32 %v2108_v14, %v2176_v16  ;;  %v800_v42 = vmul.f32 %v2091_v52, %v2176_v16 }
 0x2a4   : > { %v856_v26 = vsel %vm223_vm0, %v794_v62, 0.0  ;;  %v802_v14 = vmul.f32 %v2101_v13, %v2176_v16  ;;  %v807_v5 = vmul.f32 %v2156_v22, %v2176_v16  ;;  %v809_v22 = vmul.f32 %v2163_v15, %v2176_v16 }
 0x2a5   : > { %827 = vadd.xlane.f32.xlu1 %v826_v29  ;;  %824 = vadd.xlane.f32.xlu0 %v823_v2  ;;  %v871_v29 = vsel %vm223_vm0, %v799_v63, 0.0  ;;  %v868_v2 = vsel %vm223_vm0, %v798_v3, 0.0  ;;  %v877_v7 = vsel %vm223_vm0, %v801_v32, 0.0  ;;  %v874_v11 = vsel %vm223_vm0, %v800_v42, 0.0 }
 0x2a6   : > { %821 = vadd.xlane.f32.xlu2 %v820_v41  ;;  %v865_v41 = vsel %vm223_vm0, %v797_v6, 0.0  ;;  %v880_v23 = vsel %vm223_vm0, %v802_v14, 0.0  ;;  %v895_v13 = vsel %vm223_vm0, %v807_v5, 0.0  ;;  %v901_v28 = vsel %vm223_vm0, %v809_v22, 0.0 }
 0x2ad   : > { %836 = vadd.xlane.f32.xlu1 %v835_v9  ;;  %833 = vadd.xlane.f32.xlu0 %v832_v12  ;;  %v804_v12 = vmul.f32 %v2132_v31, %v2176_v16  ;;  %v806_v31 = vmul.f32 %v2139_v21, %v2176_v16  ;;  %v808_v21 = vmul.f32 %v2147_v57, %v2176_v16 }
 0x2ae   : > { %830 = vadd.xlane.f32.xlu2 %v829_v56  ;;  %v803_v56 = vmul.f32 %v2117_v40, %v2176_v16  ;;  %v805_v40 = vmul.f32 %v2125_v61, %v2176_v16 }
 0x2af   : > { %v886_v52 = vsel %vm223_vm0, %v804_v12, 0.0  ;;  %v898_v34 = vsel %vm223_vm0, %v808_v21, 0.0 }
 0x2b0   : > { %v883_v59 = vsel %vm223_vm0, %v803_v56, 0.0 }
 0x2b5   : > { %845 = vadd.xlane.f32.xlu1 %v844_v10  ;;  %842 = vadd.xlane.f32.xlu0 %v841_v45  ;;  %s1327_s22 = spop %1326  ;;  %v892_v10 = vsel %vm223_vm0, %v806_v31, 0.0  ;;  %v889_v45 = vsel %vm223_vm0, %v805_v40, 0.0 }
 0x2b6   : > { %839 = vadd.xlane.f32.xlu2 %v838_v60  ;;  %s2217_s23 = smul.f32 %s1327_s22, %s2097_s19  ;;  %v810_v60 = vmul.f32 %v2171_v51, %v2176_v16 }
 0x2b8   : > { %v2225_v39 = vstv %s2217_s23  ;;  %v904_v61 = vsel %vm223_vm0, %v810_v60, 0.0 }
 0x2b9   : > { %v2231_v0 = vmul.f32 %v2225_v39, %v2151_v18  ;;  %v1043_v18 = vmul.f32 %v1378_v37, %v2225_v39  ;;  %v1046_v20 = vmul.f32 %v2225_v39, %v1943_v8  ;;  %v1045_v51 = vmul.f32 %v2225_v39, %v1921_v1 }
 0x2ba   : > { %v1047_v57 = vmul.f32 %v2225_v39, %v1923_v19  ;;  %v1049_v8 = vmul.f32 %v2225_v39, %v1966_v58  ;;  %v1048_v1 = vmul.f32 %v2225_v39, %v1925_v17  ;;  %v1050_v6 = vmul.f32 %v2225_v39, %v1927_v25 }
 0x2bb   : > { %v1044_v38 = vsub.f32 %v2176_v16, %v1043_v18  ;;  %v1052_v17 = vmul.f32 %v2225_v39, %v1987_v33 }
 0x2bd   : > { %854 = vadd.xlane.f32.xlu1 %v853_v54  ;;  %851 = vadd.xlane.f32.xlu0 %v850_v48  ;;  %v1109_v55 = vmul.f32 %v1044_v38, %v1044_v38 }
 0x2be   : > { %848 = vadd.xlane.f32.xlu2 %v847_v44 }
 0x2bf   : > { %v1111_v53 = vrot.slane %v1109_v55, 1 }
 0x2c1   : > { %v1113_v9 = vsel %vm1013_vm1, %v1111_v53, 0.0  ;;  %v1051_v53 = vmul.f32 %v2225_v39, %v1929_v46 }
 0x2c5   : > { %863 = vadd.xlane.f32.xlu1 %v862_v35  ;;  %860 = vadd.xlane.f32.xlu0 %v859_v47 }
 0x2c6   : > { %857 = vadd.xlane.f32.xlu2 %v856_v26 }
 0x2cd   : > { %872 = vadd.xlane.f32.xlu1 %v871_v29  ;;  %869 = vadd.xlane.f32.xlu0 %v868_v2 }
 0x2ce   : > { %866 = vadd.xlane.f32.xlu2 %v865_v41 }
 0x2d5   : > { %878 = vadd.xlane.f32.xlu1 %v877_v7  ;;  %875 = vadd.xlane.f32.xlu0 %v874_v11 }
 0x2d6   : > { %1114 = vadd.xlane.f32.xlu2 %v1113_v9 }
 0x2dd   : > { %887 = vadd.xlane.f32.xlu1 %v886_v52  ;;  %884 = vadd.xlane.f32.xlu0 %v883_v59  ;;  %v1053_v52 = vmul.f32 %v2225_v39, %v1936_v36 }
 0x2de   : > { %881 = vadd.xlane.f32.xlu2 %v880_v23 }
 0x2e5   : > { %896 = vadd.xlane.f32.xlu1 %v895_v13  ;;  %893 = vadd.xlane.f32.xlu0 %v892_v10  ;;  %v1055_v13 = vmul.f32 %v2225_v39, %v2011_v27 }
 0x2e6   : > { %890 = vadd.xlane.f32.xlu2 %v889_v45  ;;  %v1054_v45 = vmul.f32 %v2225_v39, %v1951_v43 }
 0x2ed   : > { %905 = vadd.xlane.f32.xlu1 %v904_v61  ;;  %902 = vadd.xlane.f32.xlu0 %v901_v28 }
 0x2ee   : > { %899 = vadd.xlane.f32.xlu2 %v898_v34 }
 0x310   : > { %v819_v54 = vpop.xlane.xlu1 %818  ;;  %v816_v15 = vpop.xlane.xlu0 %815 }
 0x311   : > { %v1078_v48 = vsub.f32 %v816_v15, %v1046_v20  ;;  %v813_v44 = vpop.xlane.xlu2 %812  ;;  %v1079_v4 = vsub.f32 %v819_v54, %v1047_v57 }
 0x312   : > { %v1077_v16 = vsub.f32 %v813_v44, %v1045_v51  ;;  %v1056_v51 = vmul.f32 %v2225_v39, %v1968_v30 }
 0x313   : > { %v1124_v49 = vmul.f32 %v1078_v48, %v1078_v48  ;;  %v1125_v26 = vmul.f32 %v1079_v4, %v1079_v4 }
 0x314   : > { %v1123_v62 = vmul.f32 %v1077_v16, %v1077_v16  ;;  %v2432_v16 = vld [vmem:[#allocation6_spill] sm:$0xff] }
 0x315   : > { %v1156_v35 = vsel %vm939_vm2, %v1124_v49, 0.0  ;;  %v1158_v29 = vsel %vm939_vm2, %v1125_v26, 0.0  ;;  %v1058_v49 = vmul.f32 %v2225_v39, %v2432_v16 }
 0x316   : > { %v1155_v47 = vsel %vm939_vm2, %v1123_v62, 0.0  ;;  %v2433_v62 = vld [vmem:[#allocation2_spill] sm:$0xff] }
 0x317   : > { %v1157_v63 = vadd.f32 %v1156_v35, %v1155_v47  ;;  %v1057_v35 = vmul.f32 %v2225_v39, %v2433_v62 }
 0x318   : > { %v828_v37 = vpop.xlane.xlu1 %827  ;;  %v825_v18 = vpop.xlane.xlu0 %824 }
 0x319   : > { %v1081_v3 = vsub.f32 %v825_v18, %v1049_v8  ;;  %v822_v19 = vpop.xlane.xlu2 %821  ;;  %v1082_v2 = vsub.f32 %v828_v37, %v1050_v6  ;;  %v1159_v32 = vadd.f32 %v1158_v29, %v1157_v63  ;;  %v2434_v18 = vld [vmem:[#allocation3_spill] sm:$0xff] }
 0x31a   : > { %v1080_v38 = vsub.f32 %v822_v19, %v1048_v1  ;;  %v1059_v63 = vmul.f32 %v2225_v39, %v2434_v18 }
 0x31b   : > { %v1127_v41 = vmul.f32 %v1081_v3, %v1081_v3  ;;  %v1128_v7 = vmul.f32 %v1082_v2, %v1082_v2 }
 0x31c   : > { %v1126_v55 = vmul.f32 %v1080_v38, %v1080_v38 }
 0x31d   : > { %v1162_v11 = vsel %vm939_vm2, %v1127_v41, 0.0  ;;  %v1164_v23 = vsel %vm939_vm2, %v1128_v7, 0.0 }
 0x31e   : > { %v1160_v58 = vsel %vm939_vm2, %v1126_v55, 0.0  ;;  %v2435_v55 = vld [vmem:[#allocation9_spill] sm:$0xff] }
 0x31f   : > { %v1161_v42 = vadd.f32 %v1160_v58, %v1159_v32  ;;  %v1061_v32 = vmul.f32 %v2225_v39, %v2435_v55 }
 0x320   : > { %v837_v25 = vpop.xlane.xlu1 %836  ;;  %v834_v9 = vpop.xlane.xlu0 %833 }
 0x321   : > { %v1163_v12 = vadd.f32 %v1162_v11, %v1161_v42  ;;  %v1084_v56 = vsub.f32 %v834_v9, %v1052_v17  ;;  %v831_v14 = vpop.xlane.xlu2 %830  ;;  %v1085_v5 = vsub.f32 %v837_v25, %v1053_v52  ;;  %v2436_v42 = vld [vmem:[#allocation4_spill] sm:$0xff] }
 0x322   : > { %v1083_v59 = vsub.f32 %v831_v14, %v1051_v53  ;;  %v1060_v53 = vmul.f32 %v2225_v39, %v2436_v42  ;;  %v2437_v14 = vld [vmem:[#allocation5_spill] sm:$0xff] }
 0x323   : > { %v1130_v33 = vmul.f32 %v1084_v56, %v1084_v56  ;;  %v1165_v40 = vadd.f32 %v1164_v23, %v1163_v12  ;;  %v1131_v60 = vmul.f32 %v1085_v5, %v1085_v5  ;;  %v1062_v52 = vmul.f32 %v2225_v39, %v2437_v14 }
 0x324   : > { %v1129_v31 = vmul.f32 %v1083_v59, %v1083_v59 }
 0x325   : > { %v1168_v22 = vsel %vm939_vm2, %v1130_v33, 0.0  ;;  %v1170_v54 = vsel %vm939_vm2, %v1131_v60, 0.0 }
 0x326   : > { %v1166_v46 = vsel %vm939_vm2, %v1129_v31, 0.0 }
 0x327   : > { %v1167_v10 = vadd.f32 %v1166_v46, %v1165_v40 }
 0x328   : > { %v846_v36 = vpop.xlane.xlu1 %845  ;;  %v843_v21 = vpop.xlane.xlu0 %842 }
 0x329   : > { %v1169_v61 = vadd.f32 %v1168_v22, %v1167_v10  ;;  %v1087_v28 = vsub.f32 %v843_v21, %v1055_v13  ;;  %v840_v34 = vpop.xlane.xlu2 %839  ;;  %v1088_v27 = vsub.f32 %v846_v36, %v1056_v51  ;;  %v2439_v22 = vld [vmem:[#allocation11_spill] sm:$0xff] }
 0x32a   : > { %v1086_v20 = vsub.f32 %v840_v34, %v1054_v45  ;;  %v2438_v45 = vld [vmem:[#allocation7_spill] sm:$0xff]  ;;  %v1064_v36 = vmul.f32 %v2225_v39, %v2439_v22 }
 0x32b   : > { %v1133_v48 = vmul.f32 %v1087_v28, %v1087_v28  ;;  %v1171_v44 = vadd.f32 %v1170_v54, %v1169_v61  ;;  %v1134_v47 = vmul.f32 %v1088_v27, %v1088_v27  ;;  %v1063_v60 = vmul.f32 %v2225_v39, %v2438_v45 }
 0x32c   : > { %v1132_v15 = vmul.f32 %v1086_v20, %v1086_v20 }
 0x32d   : > { %v1174_v8 = vsel %vm939_vm2, %v1133_v48, 0.0  ;;  %v1176_v19 = vsel %vm939_vm2, %v1134_v47, 0.0 }
 0x32e   : > { %v1172_v43 = vsel %vm939_vm2, %v1132_v15, 0.0  ;;  %v2440_v15 = vld [vmem:[#allocation8_spill] sm:$0xff] }
 0x32f   : > { %v1173_v57 = vadd.f32 %v1172_v43, %v1171_v44  ;;  %v1065_v27 = vmul.f32 %v2225_v39, %v2440_v15 }
 0x330   : > { %v855_v4 = vpop.xlane.xlu1 %854  ;;  %v852_v30 = vpop.xlane.xlu0 %851 }
 0x331   : > { %v1175_v1 = vadd.f32 %v1174_v8, %v1173_v57  ;;  %v1090_v26 = vsub.f32 %v852_v30, %v1058_v49  ;;  %v849_v37 = vpop.xlane.xlu2 %848  ;;  %v1091_v6 = vsub.f32 %v855_v4, %v1059_v63  ;;  %v2441_v4 = vld [vmem:[#allocation10_spill] sm:$0xff] }
 0x332   : > { %v1089_v3 = vsub.f32 %v849_v37, %v1057_v35  ;;  %v1066_v62 = vmul.f32 %v2225_v39, %v2441_v4  ;;  %v2442_v30 = vld [vmem:[#allocation14_spill] sm:$0xff] }
 0x333   : > { %v1136_v38 = vmul.f32 %v1090_v26, %v1090_v26  ;;  %v1177_v2 = vadd.f32 %v1176_v19, %v1175_v1  ;;  %v1137_v7 = vmul.f32 %v1091_v6, %v1091_v6  ;;  %v1067_v1 = vmul.f32 %v2225_v39, %v2442_v30  ;;  %v2448_v30 = vld [vmem:[#allocation18_spill] sm:$0xff] }
 0x334   : > { %v1135_v29 = vmul.f32 %v1089_v3, %v1089_v3 }
 0x335   : > { %v1180_v11 = vsel %vm939_vm2, %v1136_v38, 0.0  ;;  %v1182_v23 = vsel %vm939_vm2, %v1137_v7, 0.0  ;;  %v2444_v7 = vld [vmem:[#allocation12_spill] sm:$0xff] }
 0x336   : > { %v1178_v41 = vsel %vm939_vm2, %v1135_v29, 0.0 }
 0x337   : > { %v1179_v58 = vadd.f32 %v1178_v41, %v1177_v2 }
 0x338   : > { %v864_v17 = vpop.xlane.xlu1 %863  ;;  %v861_v25 = vpop.xlane.xlu0 %860 }
 0x339   : > { %v1181_v9 = vadd.f32 %v1180_v11, %v1179_v58  ;;  %v1093_v12 = vsub.f32 %v861_v25, %v1061_v32  ;;  %v858_v56 = vpop.xlane.xlu2 %857  ;;  %v1094_v5 = vsub.f32 %v864_v17, %v1062_v52  ;;  %v2443_v32 = vld [vmem:[#allocation13_spill] sm:$0xff]  ;;  %v1068_v11 = vmul.f32 %v2225_v39, %v2444_v7 }
 0x33a   : > { %v1092_v59 = vsub.f32 %v858_v56, %v1060_v53  ;;  %v1069_v58 = vmul.f32 %v2225_v39, %v2443_v32  ;;  %v2445_v52 = vld [vmem:[#allocation17_spill] sm:$0xff] }
 0x33b   : > { %v1139_v33 = vmul.f32 %v1093_v12, %v1093_v12  ;;  %v1183_v40 = vadd.f32 %v1182_v23, %v1181_v9  ;;  %v1140_v21 = vmul.f32 %v1094_v5, %v1094_v5 }
 0x33c   : > { %v1138_v31 = vmul.f32 %v1092_v59, %v1092_v59  ;;  %v1070_v59 = vmul.f32 %v2225_v39, %v2445_v52 }
 0x33d   : > { %v1186_v61 = vsel %vm939_vm2, %v1139_v33, 0.0  ;;  %v1188_v48 = vsel %vm939_vm2, %v1140_v21, 0.0 }
 0x33e   : > { %v1184_v46 = vsel %vm939_vm2, %v1138_v31, 0.0 }
 0x33f   : > { %v1185_v13 = vadd.f32 %v1184_v46, %v1183_v40 }
 0x340   : > { %v873_v10 = vpop.xlane.xlu1 %872  ;;  %v870_v28 = vpop.xlane.xlu0 %869 }
 0x341   : > { %v1187_v34 = vadd.f32 %v1186_v61, %v1185_v13  ;;  %v867_v20 = vpop.xlane.xlu2 %866  ;;  %v1096_v51 = vsub.f32 %v870_v28, %v1064_v36  ;;  %v1097_v57 = vsub.f32 %v873_v10, %v1065_v27  ;;  %v2447_v61 = vld [vmem:[#allocation15_spill] sm:$0xff] }
 0x342   : > { %v1095_v54 = vsub.f32 %v867_v20, %v1063_v60  ;;  %v2446_v60 = vld [vmem:[#allocation16_spill] sm:$0xff]  ;;  %v1071_v28 = vmul.f32 %v2225_v39, %v2447_v61 }
 0x343   : > { %v1189_v43 = vadd.f32 %v1188_v48, %v1187_v34  ;;  %v1142_v16 = vmul.f32 %v1096_v51, %v1096_v51  ;;  %v1143_v18 = vmul.f32 %v1097_v57, %v1097_v57  ;;  %v1072_v22 = vmul.f32 %v2225_v39, %v2446_v60 }
 0x344   : > { %v1141_v44 = vmul.f32 %v1095_v54, %v1095_v54 }
 0x345   : > { %v1192_v63 = vsel %vm939_vm2, %v1142_v16, 0.0  ;;  %v1194_v2 = vsel %vm939_vm2, %v1143_v18, 0.0 }
 0x346   : > { %v1190_v49 = vsel %vm939_vm2, %v1141_v44, 0.0 }
 0x347   : > { %v1191_v35 = vadd.f32 %v1190_v49, %v1189_v43 }
 0x348   : > { %v879_v47 = vpop.xlane.xlu1 %878  ;;  %v876_v8 = vpop.xlane.xlu0 %875 }
 0x349   : > { %v1098_v26 = vsub.f32 %v876_v8, %v1066_v62  ;;  %v1115_v37 = vpop.xlane.xlu2 %1114  ;;  %v1193_v19 = vadd.f32 %v1192_v63, %v1191_v35  ;;  %v1099_v6 = vsub.f32 %v879_v47, %v1067_v1  ;;  %v1075_v35 = vmul.f32 %v2225_v39, %v2153_v24 }
 0x34a   : > { %v1116_v3 = vrot.slane %v1115_v37, 4  ;;  %v1074_v1 = vmul.f32 %v2225_v39, %v2448_v30 }
 0x34b   : > { %v1144_v38 = vmul.f32 %v1098_v26, %v1098_v26  ;;  %v1145_v17 = vmul.f32 %v1099_v6, %v1099_v6  ;;  %v1195_v42 = vadd.f32 %v1194_v2, %v1193_v19 }
 0x34c   : > { %v1117_v29 = vadd.f32 %v1116_v3, %v1115_v37 }
 0x34d   : > { %v1196_v41 = vsel %vm939_vm2, %v1144_v38, 0.0  ;;  %v1198_v33 = vsel %vm939_vm2, %v1145_v17, 0.0 }
 0x34e   : > { %v1118_v55 = vrot.slane %v1117_v29, 2  ;;  %v1197_v12 = vadd.f32 %v1196_v41, %v1195_v42 }
 0x350   : > { %v888_v53 = vpop.xlane.xlu1 %887  ;;  %v885_v25 = vpop.xlane.xlu0 %884  ;;  %v1119_v9 = vadd.f32 %v1118_v55, %v1117_v29  ;;  %v1199_v10 = vadd.f32 %v1198_v33, %v1197_v12 }
 0x351   : > { %v1101_v56 = vsub.f32 %v885_v25, %v1069_v58  ;;  %v882_v14 = vpop.xlane.xlu2 %881  ;;  %v1102_v31 = vsub.f32 %v888_v53, %v1070_v59 }
 0x352   : > { %v1100_v23 = vsub.f32 %v882_v14, %v1068_v11  ;;  %v1120_v5 = vrot.slane %v1119_v9, 1 }
 0x353   : > { %v1147_v40 = vmul.f32 %v1101_v56, %v1101_v56  ;;  %v1148_v34 = vmul.f32 %v1102_v31, %v1102_v31 }
 0x354   : > { %v1146_v46 = vmul.f32 %v1100_v23, %v1100_v23  ;;  %v1121_v13 = vadd.f32 %v1120_v5, %v1119_v9 }
 0x355   : > { %v1202_v20 = vsel %vm939_vm2, %v1147_v40, 0.0  ;;  %v1204_v43 = vsel %vm939_vm2, %v1148_v34, 0.0 }
 0x356   : > { %v1200_v45 = vsel %vm939_vm2, %v1146_v46, 0.0  ;;  %1328 = vpush %v1121_v13 }
 0x357   : > { %v1201_v36 = vadd.f32 %v1200_v45, %v1199_v10 }
 0x358   : > { %v897_v21 = vpop.xlane.xlu1 %896  ;;  %v894_v51 = vpop.xlane.xlu0 %893 }
 0x359   : > { %v1203_v54 = vadd.f32 %v1202_v20, %v1201_v36  ;;  %v1104_v15 = vsub.f32 %v894_v51, %v1072_v22  ;;  %v891_v27 = vpop.xlane.xlu2 %890  ;;  %v1105_v48 = vsub.f32 %v897_v21, %v2231_v0  ;;  %v1076_v0 = vmul.f32 %v2225_v39, %v2168_v50 }
 0x35a   : > { %v1103_v44 = vsub.f32 %v891_v27, %v1071_v28 }
 0x35b   : > { %v1150_v57 = vmul.f32 %v1104_v15, %v1104_v15  ;;  %v1205_v49 = vadd.f32 %v1204_v43, %v1203_v54  ;;  %v1151_v4 = vmul.f32 %v1105_v48, %v1105_v48 }
 0x35c   : > { %v1149_v16 = vmul.f32 %v1103_v44, %v1103_v44 }
 0x35d   : > { %v1208_v26 = vsel %vm939_vm2, %v1150_v57, 0.0  ;;  %v1210_v19 = vsel %vm939_vm2, %v1151_v4, 0.0 }
 0x35e   : > { %v1206_v62 = vsel %vm939_vm2, %v1149_v16, 0.0 }
 0x35f   : > { %v1207_v47 = vadd.f32 %v1206_v62, %v1205_v49 }
 0x360   : > { %v906_v8 = vpop.xlane.xlu1 %905  ;;  %v903_v37 = vpop.xlane.xlu0 %902 }
 0x361   : > { %v1209_v18 = vadd.f32 %v1208_v26, %v1207_v47  ;;  %v1107_v63 = vsub.f32 %v903_v37, %v1075_v35  ;;  %v900_v3 = vpop.xlane.xlu2 %899  ;;  %v1108_v6 = vsub.f32 %v906_v8, %v1076_v0 }
 0x362   : > { %v1106_v38 = vsub.f32 %v900_v3, %v1074_v1 }
 0x363   : > { %v1211_v29 = vadd.f32 %v1210_v19, %v1209_v18  ;;  %v1153_v24 = vmul.f32 %v1107_v63, %v1107_v63  ;;  %v1154_v41 = vmul.f32 %v1108_v6, %v1108_v6 }
 0x364   : > { %v1152_v2 = vmul.f32 %v1106_v38, %v1106_v38 }
 0x365   : > { %v1214_v58 = vsel %vm939_vm2, %v1153_v24, 0.0  ;;  %v1216_v39 = vsel %vm939_vm2, %v1154_v41, 0.0 }
 0x366   : > { %v1212_v55 = vsel %vm939_vm2, %v1152_v2, 0.0 }
 0x367   : > { %v1213_v32 = vadd.f32 %v1212_v55, %v1211_v29 }
 0x369   : > { %v1215_v50 = vadd.f32 %v1214_v58, %v1213_v32 }
 0x36b   : > { %v1217_v17 = vadd.f32 %v1216_v39, %v1215_v50 }
 0x36d   : > { %1218 = vadd.xlane.f32.xlu2 %v1217_v17 }
 0x387   : > { %s2383_s24 = spop %1328 }
 0x388   : > { %s1229_s25 = sadd.f32 1e-30, %s2383_s24  ;;  %s1227_s26 = smul.f32 %s2383_s24, %s2217_s23 }
 0x38a   : > { %v1230_v42 = vstv %s1229_s25 }
 0x38b   : > { %1344 = vrcp.f32 %v1230_v42  ;;  %v1242_v23 = vand.u32 2147483648, %v1230_v42  ;;  %vm1236_vm8 = vweird.f32 %v1230_v42  ;;  %v1240_v5 = vand.u32 2147483647, %v1230_v42 }
 0x38d   : > { %v1243_v46 = vor.u32 1.1754944e-38, %v1242_v23  ;;  %vm1241_vm10 = vcmp.eq.f32.partialorder %v1240_v5, 8.507059e+37 }
 0x391   : > { %v1345_v53 = vpop.eup %1344 }
 0x392   : > { %v1232_v7 = vmul.f32 %v1345_v53, %v1230_v42  ;;  %vm1237_vm7 = vweird.f32 %v1345_v53 }
 0x393   : > { %vm1238_vm9 = vmor %vm1236_vm8, %vm1237_vm7 }
 0x394   : > { %v1233_v11 = vsub.f32 1.0, %v1232_v7 }
 0x396   : > { %v1234_v12 = vmul.f32 %v1345_v53, %v1233_v11 }
 0x398   : > { %v1235_v52 = vadd.f32 %v1345_v53, %v1234_v12 }
 0x39a   : > { %v1239_v31 = vsel %vm1238_vm9, %v1345_v53, %v1235_v52 }
 0x39b   : > { %v1244_v13 = vsel %vm1241_vm10, %v1243_v46, %v1239_v31 }
 0x3e0   : > { %v1219_v25 = vpop.xlane.xlu2 %1218 }
 0x3e1   : > { %v1220_v9 = vrot.slane %v1219_v25, 4 }
 0x3e3   : > { %v1221_v56 = vadd.f32 %v1220_v9, %v1219_v25 }
 0x3e5   : > { %v1222_v14 = vrot.slane %v1221_v56, 2 }
 0x3e7   : > { %v1223_v59 = vadd.f32 %v1222_v14, %v1221_v56 }
 0x3e9   : > { %v1224_v33 = vrot.slane %v1223_v59, 1 }
 0x3eb   : > { %v1225_v40 = vadd.f32 %v1224_v33, %v1223_v59 }
 0x3ed   : > { %1330 = vpush %v1225_v40 }
 0x3ee   : > { %1332 = vpush %v1244_v13 }
 0x41e   : > { %s1331_s27 = spop %1330 }
 0x41f   : > { %s1228_s28 = ssub.f32 %s1331_s27, %s1227_s26  ;;  %s1333_s29 = spop %1332 }
 0x421   : > { %s1246_s30 = smul.f32 %s1333_s29, %s1228_s28 }
 0x423   : > { %s1247_s3 = smul.f32 1e-06, %s1246_s30 }
 0x425   : > { %s1248_s7 = ssub.f32 0.0, %s1247_s3 }
 0x427   : > { %v1249_v10 = vstv %s1248_s7 }
 0x428   : > { %1251 = vst.msk [vmem:[%s156_s6] sm:$0x1] %vm1250_vm11, %v1249_v10 }
 0x429 PF: > { %s12_s9 = sadd.s32 1, %s1385_s9  }
 0x42a   : > { %p9_p4 = scmp.ge.s32.totalorder %s12_s9, 4  }
 0x42c   :  { %11 = sbr.rel (!%p9_p4) target bundleno = 1 (0x1), region = 61 }

</bundles_post_ra>
